<compile_context>
chip_gen: v7x
topology: tpu7x:2x2x1
jax: 0.10.0
libtpu: 0.0.40
codegen_flags: <defaults>
</compile_context>

<pallas_src>
import functools
import math

import jax
import jax.numpy as jnp
from jax import lax
from jax.experimental import pallas as pl
from jax.experimental.pallas import tpu as pltpu

_MIN_LOGITS_VALUE = -2.3819763e38
_MAX_WAVELENGTH = 10_000.0


# -----------------------------------------------------------------------------
# Config (small, synthetic)
# -----------------------------------------------------------------------------
class GriffinConfig:
    vocab_size = 64
    width = 32
    mlp_expanded_width = 64
    num_heads = 4
    lru_width = 32
    attention_window_size = 4
    conv1d_temporal_width = 4
    logits_soft_cap = 30.0
    embeddings_scale_by_sqrt_dim = True
    block_types = ("recurrent", "recurrent", "attention")


def _gelu_tanh(x):
    # Matches torch.nn.functional.gelu(x, approximate="tanh").
    c = math.sqrt(2.0 / math.pi)
    return 0.5 * x * (1.0 + jnp.tanh(c * (x + 0.044715 * x * x * x)))


# -----------------------------------------------------------------------------
# In-kernel value helpers (shared by the fused layer kernels)
# -----------------------------------------------------------------------------
def _rmsnorm_val(x, scale):
    var = jnp.mean(jnp.square(x), axis=-1, keepdims=True)
    return x * lax.rsqrt(var + 1e-6) * (scale + 1.0)


def _mlp_residual(normed, residual, w0, b0, w1, b1, wd, bd):
    up0 = jnp.dot(normed, w0, preferred_element_type=jnp.float32) + b0
    up1 = jnp.dot(normed, w1, preferred_element_type=jnp.float32) + b1
    act = _gelu_tanh(up0) * up1
    return jnp.dot(act, wd, preferred_element_type=jnp.float32) + bd + residual


def _shift_down(x, d, fill):
    # out[i] = x[i - d] for i >= d, else `fill`.  Static-shape concat (safe lowering).
    t = x.shape[0]
    pad = jnp.full((d,) + x.shape[1:], fill, x.dtype)
    return jnp.concatenate([pad, x[: t - d]], axis=0)


# -----------------------------------------------------------------------------
# Fused attention residual-layer kernel
# -----------------------------------------------------------------------------
def _attention_layer_kernel(x_ref, segq_ref, segr_ref, cosw_ref, sinw_ref,
                            tns_ref, wq_ref, wqs_ref, wk_ref, wks_ref, wv_ref,
                            wf_ref, bf_ref,
                            cns_ref, w0_ref, b0_ref, w1_ref, b1_ref, wd_ref, bd_ref,
                            o_ref, *, num_heads, head_dim, window_size):
    raw = x_ref[0]                       # (T, W)
    t = raw.shape[0]
    nh, h = num_heads, head_dim

    normed = _rmsnorm_val(raw, tns_ref[...])

    cos_w = cosw_ref[0]                  # (T, W) cos table tiled to full width
    sin_w = sinw_ref[0]                  # (T, W) signed sin table (0s on pass half)
    cos_h = cos_w[:, :h]                 # per-head table is identical across heads
    sin_h = sin_w[:, :h]

    # RoPE as q*cos + (x @ Wq_swapped)*sin: the half-swap lives in a column-permuted
    # weight copy (extra MXU matmul, no lane shuffles).  h**-0.5 folded into Wq.
    q = jnp.dot(normed, wq_ref[...], preferred_element_type=jnp.float32)     # (T, W)
    q_sw = jnp.dot(normed, wqs_ref[...], preferred_element_type=jnp.float32)
    q_rot = q * cos_w + q_sw * sin_w

    k = jnp.dot(normed, wk_ref[...], preferred_element_type=jnp.float32)     # (T, H)
    k_sw = jnp.dot(normed, wks_ref[...], preferred_element_type=jnp.float32)
    k_rot = k * cos_h + k_sw * sin_h
    v = jnp.dot(normed, wv_ref[...], preferred_element_type=jnp.float32)     # (T, H)

    # Heads folded into the row axis: rows = head*T + query_pos (single matmul for all
    # heads — MQA shares K/V, no stack/broadcast/batched einsum).
    q2 = jnp.concatenate([q_rot[:, n * h:(n + 1) * h] for n in range(nh)], axis=0)
    logits = lax.dot_general(q2, k_rot, (((1,), (1,)), ((), ())),
                             preferred_element_type=jnp.float32)             # (nh*T, T)

    # Windowed-causal same-document mask built in-kernel from iota + segment ids.
    r = lax.broadcasted_iota(jnp.int32, (nh * t, t), 0)
    tj = lax.broadcasted_iota(jnp.int32, (nh * t, t), 1)
    if t & (t - 1) == 0:
        ti = jnp.bitwise_and(r, t - 1)      # query position = row mod T (T power of 2)
    else:
        ti = r % t
    mask = (segq_ref[0] == segr_ref[0]) & (ti >= tj) & (ti <= tj + window_size)

    masked = jnp.where(mask, logits, _MIN_LOGITS_VALUE)
    mmax = jnp.max(masked, axis=-1, keepdims=True)
    pexp = jnp.exp(masked - mmax)
    ssum = jnp.sum(pexp, axis=-1, keepdims=True)
    r0 = pl.reciprocal(ssum, approx=True)        # EUP approx + one Newton step
    inv = r0 * (2.0 - ssum * r0)
    probs = pexp * inv

    enc2 = jnp.dot(probs, v, preferred_element_type=jnp.float32)             # (nh*T, H)
    encf = jnp.concatenate([enc2[n * t:(n + 1) * t, :] for n in range(nh)], axis=1)
    attn = jnp.dot(encf, wf_ref[...], preferred_element_type=jnp.float32) + bf_ref[...]

    # Fused residual + channel norm + MLP + residual epilogue.
    residual = attn + raw
    normed2 = _rmsnorm_val(residual, cns_ref[...])
    o_ref[0] = _mlp_residual(normed2, residual, w0_ref[...], b0_ref[...],
                             w1_ref[...], b1_ref[...], wd_ref[...], bd_ref[...])


def _swap_rope_columns(mat, heads, head_dim):
    # Per-head column permutation [first, second, pass] -> [second, first, pass].
    q4 = head_dim // 4
    parts = []
    for n in range(heads):
        b0 = n * head_dim
        parts.append(mat[:, b0 + q4: b0 + 2 * q4])
        parts.append(mat[:, b0: b0 + q4])
        parts.append(mat[:, b0 + 2 * q4: b0 + head_dim])
    return jnp.concatenate(parts, axis=1)


def attention_layer(x, seg_q, seg_row, cos_w, sin_w, p, cfg):
    b, t, w = x.shape
    nh = cfg.num_heads
    h = w // nh
    e = cfg.mlp_expanded_width
    scale = h ** -0.5
    wq = p["wq"] * scale
    wq_sw = _swap_rope_columns(p["wq"], nh, h) * scale
    wk_sw = _swap_rope_columns(p["wk"], 1, h)
    kernel = functools.partial(_attention_layer_kernel, num_heads=nh, head_dim=h,
                               window_size=cfg.attention_window_size)
    rep = lambda i: (0, 0)
    return pl.pallas_call(
        kernel,
        out_shape=jax.ShapeDtypeStruct((b, t, w), jnp.float32),
        grid=(b,),
        in_specs=[
            pl.BlockSpec((1, t, w), lambda i: (i, 0, 0)),       # x
            pl.BlockSpec((1, t * nh, 1), lambda i: (i, 0, 0)),  # seg id per (head,query) row
            pl.BlockSpec((1, 1, t), lambda i: (i, 0, 0)),       # seg id per key col
            pl.BlockSpec((1, t, w), lambda i: (i, 0, 0)),       # cos (tiled to width)
            pl.BlockSpec((1, t, w), lambda i: (i, 0, 0)),       # sin (signed, tiled)
            pl.BlockSpec((1, w), rep),                          # temporal norm scale
            pl.BlockSpec((w, w), rep),                          # wq (scaled)
            pl.BlockSpec((w, w), rep),                          # wq swapped (scaled)
            pl.BlockSpec((w, h), rep),                          # wk
            pl.BlockSpec((w, h), rep),                          # wk swapped
            pl.BlockSpec((w, h), rep),                          # wv
            pl.BlockSpec((w, w), rep),                          # wf
            pl.BlockSpec((1, w), rep),                          # bf
            pl.BlockSpec((1, w), rep),                          # channel norm scale
            pl.BlockSpec((w, e), rep), pl.BlockSpec((1, e), rep),
            pl.BlockSpec((w, e), rep), pl.BlockSpec((1, e), rep),
            pl.BlockSpec((e, w), rep), pl.BlockSpec((1, w), rep),
        ],
        out_specs=pl.BlockSpec((1, t, w), lambda i: (i, 0, 0)),
        compiler_params=pltpu.CompilerParams(dimension_semantics=("parallel",)),
    )(x, seg_q, seg_row, cos_w, sin_w,
      p["temporal_norm_scale"], wq, wq_sw, p["wk"], wk_sw, p["wv"], p["wf"], p["bf"],
      p["channel_norm_scale"], p["mlp_w0"], p["mlp_b0"], p["mlp_w1"], p["mlp_b1"],
      p["mlp_wd"], p["mlp_bd"])


# -----------------------------------------------------------------------------
# Fused recurrent residual-layer kernel
# -----------------------------------------------------------------------------
def _recurrent_layer_kernel(x_ref, reset_ref,
                            tns_ref, wy_ref, by_ref, wx_ref, bx_ref,
                            convw_ref, convb_ref, n8sa_ref,
                            wig_ref, big_ref, wag_ref, bag_ref,
                            wout_ref, bout_ref,
                            cns_ref, w0_ref, b0_ref, w1_ref, b1_ref, wd_ref, bd_ref,
                            o_ref, *, temporal_width, seq_len):
    raw = x_ref[0]                       # (T, W)
    reset = reset_ref[0]                 # (T, 1) float {0,1}; 1 where segment_pos == 0
    notreset = 1.0 - reset

    normed = _rmsnorm_val(raw, tns_ref[...])

    # y-branch: linear + GeLU; x-branch: linear.
    y_branch = _gelu_tanh(
        jnp.dot(normed, wy_ref[...], preferred_element_type=jnp.float32) + by_ref[...])
    xx = jnp.dot(normed, wx_ref[...], preferred_element_type=jnp.float32) + bx_ref[...]

    t = seq_len
    tw = temporal_width
    wconv = convw_ref[...]               # (TW, L)

    # Document-masked causal temporal conv via static shifts; the reset mask is a
    # running product of shifted (1 - reset) built in-kernel (no (B,TW,T,1) input).
    conv_out = xx * wconv[tw - 1: tw, :]
    shifted = xx
    prodmask = None
    for s in range(1, min(tw, t)):
        shifted = _shift_down(shifted, 1, 0.0)                   # xx delayed by s
        if s == 1:
            prodmask = notreset
        else:
            prodmask = notreset * _shift_down(prodmask, 1, 1.0)
        conv_out = conv_out + shifted * prodmask * wconv[tw - 1 - s: tw - s, :]
    conv_out = conv_out + convb_ref[...]

    # RG-LRU gates.  -8 * softplus(a_param) is precomputed in the wrapper.
    # TODO(synk): exploit the block-diagonal per-head gate structure at realistic lru_width.
    gate_x = jax.nn.sigmoid(
        jnp.dot(conv_out, wig_ref[...], preferred_element_type=jnp.float32) + big_ref[...])
    gate_a = jax.nn.sigmoid(
        jnp.dot(conv_out, wag_ref[...], preferred_element_type=jnp.float32) + bag_ref[...])
    log_a = gate_a * n8sa_ref[...]
    a = jnp.exp(log_a)
    a_sq = a * a                                   # no second exp
    multiplier = jnp.sqrt(1.0 - a_sq)
    multiplier = reset + notreset * multiplier
    xs = conv_out * gate_x * multiplier            # scan input
    aa = a * notreset                              # scan decay (cut across documents)

    # Linear recurrence y_i = a_i*y_{i-1} + x_i via log-depth (Hillis-Steele) scan on
    # the full (T, L) tile: ceil(log2 T) combine steps, no per-row sublane extracts.
    d = 1
    while d < t:
        a_prev = _shift_down(aa, d, 1.0)
        x_prev = _shift_down(xs, d, 0.0)
        xs = aa * x_prev + xs
        aa = aa * a_prev
        d *= 2
    y_seq = xs

    gated = y_seq * y_branch
    rec_out = jnp.dot(gated, wout_ref[...], preferred_element_type=jnp.float32) + bout_ref[...]

    # Fused residual + channel norm + MLP + residual epilogue.
    residual = rec_out + raw
    normed2 = _rmsnorm_val(residual, cns_ref[...])
    o_ref[0] = _mlp_residual(normed2, residual, w0_ref[...], b0_ref[...],
                             w1_ref[...], b1_ref[...], wd_ref[...], bd_ref[...])


def recurrent_layer(x, reset_f, p, cfg):
    b, t, w = x.shape
    l = cfg.lru_width
    tw = cfg.conv1d_temporal_width
    e = cfg.mlp_expanded_width
    n8sa = -8.0 * jax.nn.softplus(p["a_param"])     # (1, L), hoisted out of the kernel
    kernel = functools.partial(_recurrent_layer_kernel, temporal_width=tw, seq_len=t)
    rep = lambda i: (0, 0)
    return pl.pallas_call(
        kernel,
        out_shape=jax.ShapeDtypeStruct((b, t, w), jnp.float32),
        grid=(b,),
        in_specs=[
            pl.BlockSpec((1, t, w), lambda i: (i, 0, 0)),
            pl.BlockSpec((1, t, 1), lambda i: (i, 0, 0)),
            pl.BlockSpec((1, w), rep),
            pl.BlockSpec((w, l), rep), pl.BlockSpec((1, l), rep),
            pl.BlockSpec((w, l), rep), pl.BlockSpec((1, l), rep),
            pl.BlockSpec((tw, l), rep), pl.BlockSpec((1, l), rep),
            pl.BlockSpec((1, l), rep),
            pl.BlockSpec((l, l), rep), pl.BlockSpec((1, l), rep),
            pl.BlockSpec((l, l), rep), pl.BlockSpec((1, l), rep),
            pl.BlockSpec((l, w), rep), pl.BlockSpec((1, w), rep),
            pl.BlockSpec((1, w), rep),
            pl.BlockSpec((w, e), rep), pl.BlockSpec((1, e), rep),
            pl.BlockSpec((w, e), rep), pl.BlockSpec((1, e), rep),
            pl.BlockSpec((e, w), rep), pl.BlockSpec((1, w), rep),
        ],
        out_specs=pl.BlockSpec((1, t, w), lambda i: (i, 0, 0)),
        compiler_params=pltpu.CompilerParams(dimension_semantics=("parallel",)),
    )(x, reset_f,
      p["temporal_norm_scale"], p["wy"], p["by"], p["wx"], p["bx"],
      p["conv_w"], p["conv_b"], n8sa,
      p["wig"], p["big"], p["wag"], p["bag"], p["wout"], p["bout"],
      p["channel_norm_scale"], p["mlp_w0"], p["mlp_b0"], p["mlp_w1"], p["mlp_b1"],
      p["mlp_wd"], p["mlp_bd"])


# -----------------------------------------------------------------------------
# Fused final norm + decode head
# -----------------------------------------------------------------------------
def _final_kernel(x_ref, scale_ref, emb_ref, o_ref, *, soft_cap):
    xn = _rmsnorm_val(x_ref[...], scale_ref[...])
    # Contract against the embedding directly (no materialized E^T).
    logits = lax.dot_general(xn, emb_ref[...], (((1,), (1,)), ((), ())),
                             preferred_element_type=jnp.float32)
    if soft_cap:
        logits = jnp.tanh(logits * (1.0 / soft_cap)) * soft_cap
    o_ref[...] = logits


def final_decode(x2d, scale, emb, soft_cap):
    m, w = x2d.shape
    v = emb.shape[0]
    # Single block at small M (one weight load, one store); tile M only when large.
    if m <= 512 or m % 8 != 0:
        tm = m
    elif m % 256 == 0:
        tm = 256
    elif m % 128 == 0:
        tm = 128
    else:
        tm = 8
    kernel = functools.partial(_final_kernel, soft_cap=soft_cap)
    return pl.pallas_call(
        kernel,
        out_shape=jax.ShapeDtypeStruct((m, v), jnp.float32),
        grid=(m // tm,),
        in_specs=[pl.BlockSpec((tm, w), lambda i: (i, 0)),
                  pl.BlockSpec((1, w), lambda i: (0, 0)),
                  pl.BlockSpec((v, w), lambda i: (0, 0))],
        out_specs=pl.BlockSpec((tm, v), lambda i: (i, 0)),
        compiler_params=pltpu.CompilerParams(dimension_semantics=("parallel",)),
    )(x2d, scale, emb)


# -----------------------------------------------------------------------------
# JAX glue: RoPE tables + (reference-only) attention mask
# -----------------------------------------------------------------------------
def forward_pass_mask(segment_pos, window_size):
    # Reference-only helper (the Pallas kernel builds the mask in-kernel).
    b, t = segment_pos.shape
    seg_ids = jnp.cumsum((segment_pos == 0).astype(jnp.int32), axis=-1)
    pos = jnp.arange(t)
    causal = pos[:, None] >= pos[None, :]
    window = pos[:, None] <= pos[None, :] + window_size
    same = seg_ids[:, :, None] == seg_ids[:, None, :]
    return (same & causal[None] & window[None]).astype(jnp.float32)


def rope_tables(segment_pos, head_dim):
    b, t = segment_pos.shape
    rope_dim = head_dim // 2
    quarter = rope_dim // 2
    freq = jnp.arange(quarter, dtype=jnp.float32)
    timescale = _MAX_WAVELENGTH ** (2.0 * freq / rope_dim)
    sinusoid = segment_pos[..., None].astype(jnp.float32) / timescale[None, None, :]
    sin, cos = jnp.sin(sinusoid), jnp.cos(sinusoid)
    ones = jnp.ones((b, t, head_dim - rope_dim), jnp.float32)
    zeros = jnp.zeros((b, t, head_dim - rope_dim), jnp.float32)
    cos_t = jnp.concatenate([cos, cos, ones], axis=-1)
    sin_t = jnp.concatenate([-sin, sin, zeros], axis=-1)
    return cos_t, sin_t


# -----------------------------------------------------------------------------
# Parameters (deterministic, synthetic)
# -----------------------------------------------------------------------------
def init_params(key, cfg):
    w, l, nh = cfg.width, cfg.lru_width, cfg.num_heads
    bw = cfg.lru_width // nh
    e, v, tw = cfg.mlp_expanded_width, cfg.vocab_size, cfg.conv1d_temporal_width
    n_layers = len(cfg.block_types)
    final_scale = 2.0 / n_layers

    kit = iter(jax.random.split(key, 128))

    def nrm(shape, std):
        return jax.random.normal(next(kit), shape, jnp.float32) * std

    params = {
        "embedding": nrm((v, w), 1.0 / math.sqrt(w)),
        "final_norm_scale": nrm((1, w), 0.1),
        "blocks": [],
    }
    for block_type in cfg.block_types:
        p = {
            "type": block_type,
            "temporal_norm_scale": nrm((1, w), 0.1),
            "channel_norm_scale": nrm((1, w), 0.1),
            "mlp_w0": nrm((w, e), math.sqrt(1.0 / w)),
            "mlp_b0": nrm((1, e), 0.01),
            "mlp_w1": nrm((w, e), math.sqrt(1.0 / w)),
            "mlp_b1": nrm((1, e), 0.01),
            "mlp_wd": nrm((e, w), math.sqrt(final_scale / e)),
            "mlp_bd": nrm((1, w), 0.01),
        }
        if block_type == "attention":
            p["wq"] = nrm((w, w), math.sqrt(1.0 / w))              # columns head-major
            p["wk"] = nrm((w, w // nh), math.sqrt(1.0 / w))
            p["wv"] = nrm((w, w // nh), math.sqrt(1.0 / w))
            p["wf"] = nrm((w, w), math.sqrt(final_scale / w))       # rows head-major
            p["bf"] = nrm((1, w), 0.01)
        else:
            p["wy"] = nrm((w, l), math.sqrt(1.0 / w))
            p["by"] = nrm((1, l), 0.01)
            p["wx"] = nrm((w, l), math.sqrt(1.0 / w))
            p["bx"] = nrm((1, l), 0.01)
            p["conv_w"] = nrm((tw, l), math.sqrt(1.0 / (w * tw)))
            p["conv_b"] = nrm((1, l), 0.01)
            wig_blocks = nrm((nh, bw, bw), math.sqrt(1.0 / bw))
            wag_blocks = nrm((nh, bw, bw), math.sqrt(1.0 / bw))
            p["wig"] = jax.scipy.linalg.block_diag(*[wig_blocks[i] for i in range(nh)])
            p["wag"] = jax.scipy.linalg.block_diag(*[wag_blocks[i] for i in range(nh)])
            p["big"] = nrm((1, l), 0.01)
            p["bag"] = nrm((1, l), 0.01)
            u = jax.random.uniform(next(kit), (1, l), jnp.float32,
                                   minval=0.9 ** 2 + 1e-8, maxval=0.999 ** 2 + 1e-8)
            p["a_param"] = jnp.log(jnp.exp(-0.5 * jnp.log(u)) - 1.0)
            p["wout"] = nrm((l, w), math.sqrt(final_scale / l))
            p["bout"] = nrm((1, w), 0.01)
        params["blocks"].append(p)
    return params


# -----------------------------------------------------------------------------
# Full Griffin forward (Pallas hot path: one fused kernel per layer + head)
# -----------------------------------------------------------------------------
def griffin_forward(params, tokens, segment_pos, cfg):
    b, t = tokens.shape
    w = cfg.width
    nh = cfg.num_heads
    h = w // nh
    scale = (jnp.float32(jnp.bfloat16(math.sqrt(w)))
             if cfg.embeddings_scale_by_sqrt_dim else jnp.float32(1.0))
    # TODO(synk): token-embedding gather stays in plain JAX (pure lookup, no matmul hot path).
    x = params["embedding"][tokens] * scale

    seg_ids = jnp.cumsum((segment_pos == 0).astype(jnp.int32), axis=-1)     # (B, T)
    seg_q = jnp.tile(seg_ids, (1, nh))[..., None]                           # (B, nh*T, 1)
    seg_row = seg_ids[:, None, :]                                           # (B, 1, T)
    cos_h, sin_h = rope_tables(segment_pos, h)                              # (B, T, H)
    cos_w = jnp.tile(cos_h, (1, 1, nh))                                     # (B, T, W)
    sin_w = jnp.tile(sin_h, (1, 1, nh))
    reset_f = (segment_pos == 0).astype(jnp.float32)[..., None]             # (B, T, 1)

    for p in params["blocks"]:
        if p["type"] == "attention":
            x = attention_layer(x, seg_q, seg_row, cos_w, sin_w, p, cfg)
        else:
            x = recurrent_layer(x, reset_f, p, cfg)

    logits = final_decode(x.reshape(b * t, w), params["final_norm_scale"],
                          params["embedding"], cfg.logits_soft_cap)
    return logits.reshape(b, t, cfg.vocab_size)


# -----------------------------------------------------------------------------
# Pure-JAX reference (mirrors the PyTorch math), used as a consistency check.
# -----------------------------------------------------------------------------
def _ref_rmsnorm(x, scale):
    var = jnp.mean(jnp.square(x), axis=-1, keepdims=True)
    return x * lax.rsqrt(var + 1e-6) * (scale.reshape((1,) * (x.ndim - 1) + (-1,)) + 1.0)


def _ref_apply_rope(x, positions):
    b, t = positions.shape
    h = x.shape[-1]
    x_rope, x_pass = x[..., : h // 2], x[..., h // 2:]
    pos = positions.reshape(b, t, 1, 1).astype(jnp.float32)
    freq = jnp.arange(h // 4, dtype=jnp.float32)
    timescale = _MAX_WAVELENGTH ** (2.0 * freq / (h // 2))
    sinusoid = pos / timescale
    sin, cos = jnp.sin(sinusoid), jnp.cos(sinusoid)
    first, second = x_rope[..., : h // 4], x_rope[..., h // 4:]
    return jnp.concatenate([first * cos - second * sin,
                            second * cos + first * sin, x_pass], axis=-1)


def _ref_attention(x, segment_pos, p, num_heads, window_size):
    b, t, w = x.shape
    h = w // num_heads
    q = (x @ p["wq"]).reshape(b, t, num_heads, h)
    k = (x @ p["wk"]).reshape(b, t, 1, h)
    v = x @ p["wv"]
    q = _ref_apply_rope(q, segment_pos)
    k = _ref_apply_rope(k, segment_pos)[:, :, 0]
    mask = forward_pass_mask(segment_pos, window_size) > 0.5
    logits = jnp.einsum("btnh,bsh->bnts", q, k) * h ** (-0.5)
    masked = jnp.where(mask[:, None], logits, _MIN_LOGITS_VALUE)
    probs = jax.nn.softmax(masked, axis=-1)
    enc = jnp.einsum("bnts,bsh->btnh", probs, v).reshape(b, t, w)
    return enc @ p["wf"] + p["bf"][0]


def _ref_recurrent(x, segment_pos, p, cfg):
    b, t, _ = x.shape
    l = cfg.lru_width
    tw = cfg.conv1d_temporal_width
    y = _gelu_tanh(x @ p["wy"] + p["by"][0])
    xx = x @ p["wx"] + p["bx"][0]
    nb = segment_pos != 0
    conv_out = jnp.zeros_like(xx)
    for s in range(min(tw, t)):
        x_shift = jnp.pad(xx[:, : t - s], ((0, 0), (s, 0), (0, 0)))
        m = jnp.broadcast_to(jnp.arange(t) >= s, (b, t))
        for j in range(1, s + 1):
            idx = jnp.clip(jnp.arange(t) - s + j, 0, t - 1)
            m = m & nb[:, idx]
        conv_out = conv_out + x_shift * m[..., None] * p["conv_w"][tw - 1 - s][None, None, :]
    conv_out = conv_out + p["conv_b"][0]

    reset = segment_pos == 0
    gate_x = jax.nn.sigmoid(conv_out @ p["wig"] + p["big"][0])
    gate_a = jax.nn.sigmoid(conv_out @ p["wag"] + p["bag"][0])
    log_a = -8.0 * gate_a * jax.nn.softplus(p["a_param"][0])
    a = jnp.exp(log_a)
    a_sq = jnp.exp(2.0 * log_a)
    gated_x = conv_out * gate_x
    mult = jnp.sqrt(1.0 - a_sq)
    mult = reset[..., None] + (~reset)[..., None] * mult
    nx = gated_x * mult
    a_scan = a * (~reset)[..., None]

    def step(h_c, inp):
        a_t, x_t = inp
        h_n = a_t * h_c + x_t
        return h_n, h_n

    _, ys = lax.scan(step, jnp.zeros((b, l), jnp.float32),
                     (jnp.swapaxes(a_scan, 0, 1), jnp.swapaxes(nx, 0, 1)))
    yseq = jnp.swapaxes(ys, 0, 1)
    return (yseq * y) @ p["wout"] + p["bout"][0]


def _ref_mlp(x, p):
    up0 = x @ p["mlp_w0"] + p["mlp_b0"][0]
    up1 = x @ p["mlp_w1"] + p["mlp_b1"][0]
    return (_gelu_tanh(up0) * up1) @ p["mlp_wd"] + p["mlp_bd"][0]


def griffin_reference(params, tokens, segment_pos, cfg):
    w = cfg.width
    scale = (jnp.float32(jnp.bfloat16(math.sqrt(w)))
             if cfg.embeddings_scale_by_sqrt_dim else jnp.float32(1.0))
    x = params["embedding"][tokens] * scale
    for p in params["blocks"]:
        raw = x
        normed = _ref_rmsnorm(raw, p["temporal_norm_scale"])
        if p["type"] == "attention":
            t_out = _ref_attention(normed, segment_pos, p, cfg.num_heads,
                                   cfg.attention_window_size)
        else:
            t_out = _ref_recurrent(normed, segment_pos, p, cfg)
        residual = t_out + raw
        x = _ref_mlp(_ref_rmsnorm(residual, p["channel_norm_scale"]), p) + residual
    x = _ref_rmsnorm(x, params["final_norm_scale"])
    logits = x @ params["embedding"].T
    c = cfg.logits_soft_cap
    if c:
        logits = jnp.tanh(logits / c) * c
    return logits


# -----------------------------------------------------------------------------
# Main
# -----------------------------------------------------------------------------
if __name__ == "__main__":
    cfg = GriffinConfig()
    key = jax.random.PRNGKey(0)
    pkey, tkey = jax.random.split(key)
    params = init_params(pkey, cfg)

    batch, seq_len = 2, 8
    tokens = jax.random.randint(tkey, (batch, seq_len), 0, cfg.vocab_size, dtype=jnp.int32)
    segment_pos = jnp.tile(jnp.arange(seq_len, dtype=jnp.int32)[None], (batch, 1))

    logits = griffin_forward(params, tokens, segment_pos, cfg)
    logits = jax.block_until_ready(logits)

    ref = jax.block_until_ready(griffin_reference(params, tokens, segment_pos, cfg))

    assert logits.shape == (batch, seq_len, cfg.vocab_size)
    # Tolerance slightly above f32 roundoff: the kernel folds the q scale into Wq,
    # reorders the scan (log-depth) and uses an approx-reciprocal (+1 Newton) softmax.
    if not jnp.allclose(logits, ref, atol=2e-3, rtol=2e-3):
        max_err = float(jnp.max(jnp.abs(logits - ref)))
        raise AssertionError(f"Pallas output mismatch vs JAX reference (max err {max_err})")
    print("KERNEL_OK")
</pallas_src>

<mosaic_0001>
module attributes {stable_mosaic.version = 11 : i64} {
  func.func @_recurrent_layer_kernel(%arg0: i32, %arg1: memref<1x8x32xf32, #tpu.memory_space<vmem>>, %arg2: memref<1x8x1xf32, #tpu.memory_space<vmem>>, %arg3: memref<1x32xf32, #tpu.memory_space<vmem>>, %arg4: memref<32x32xf32, #tpu.memory_space<vmem>>, %arg5: memref<1x32xf32, #tpu.memory_space<vmem>>, %arg6: memref<32x32xf32, #tpu.memory_space<vmem>>, %arg7: memref<1x32xf32, #tpu.memory_space<vmem>>, %arg8: memref<4x32xf32, #tpu.memory_space<vmem>>, %arg9: memref<1x32xf32, #tpu.memory_space<vmem>>, %arg10: memref<1x32xf32, #tpu.memory_space<vmem>>, %arg11: memref<32x32xf32, #tpu.memory_space<vmem>>, %arg12: memref<1x32xf32, #tpu.memory_space<vmem>>, %arg13: memref<32x32xf32, #tpu.memory_space<vmem>>, %arg14: memref<1x32xf32, #tpu.memory_space<vmem>>, %arg15: memref<32x32xf32, #tpu.memory_space<vmem>>, %arg16: memref<1x32xf32, #tpu.memory_space<vmem>>, %arg17: memref<1x32xf32, #tpu.memory_space<vmem>>, %arg18: memref<32x64xf32, #tpu.memory_space<vmem>>, %arg19: memref<1x64xf32, #tpu.memory_space<vmem>>, %arg20: memref<32x64xf32, #tpu.memory_space<vmem>>, %arg21: memref<1x64xf32, #tpu.memory_space<vmem>>, %arg22: memref<64x32xf32, #tpu.memory_space<vmem>>, %arg23: memref<1x32xf32, #tpu.memory_space<vmem>>, %arg24: memref<1x8x32xf32, #tpu.memory_space<vmem>>) attributes {dimension_semantics = [#tpu.dimension_semantics<parallel>], iteration_bounds = array<i64: 2>, scalar_prefetch = 0 : i64, scratch_operands = 0 : i64, tpu.core_type = #tpu.core_type<tc>, window_params = [{transform_indices = @transform_0, window_bounds = array<i64: 1, 8, 32>}, {transform_indices = @transform_1, window_bounds = array<i64: 1, 8, 1>}, {pipeline_mode = #tpu.pipeline_mode<synchronous>, transform_indices = @transform_2, window_bounds = array<i64: 1, 32>}, {pipeline_mode = #tpu.pipeline_mode<synchronous>, transform_indices = @transform_3, window_bounds = array<i64: 32, 32>}, {pipeline_mode = #tpu.pipeline_mode<synchronous>, transform_indices = @transform_4, window_bounds = array<i64: 1, 32>}, {pipeline_mode = #tpu.pipeline_mode<synchronous>, transform_indices = @transform_5, window_bounds = array<i64: 32, 32>}, {pipeline_mode = #tpu.pipeline_mode<synchronous>, transform_indices = @transform_6, window_bounds = array<i64: 1, 32>}, {pipeline_mode = #tpu.pipeline_mode<synchronous>, transform_indices = @transform_7, window_bounds = array<i64: 4, 32>}, {pipeline_mode = #tpu.pipeline_mode<synchronous>, transform_indices = @transform_8, window_bounds = array<i64: 1, 32>}, {pipeline_mode = #tpu.pipeline_mode<synchronous>, transform_indices = @transform_9, window_bounds = array<i64: 1, 32>}, {pipeline_mode = #tpu.pipeline_mode<synchronous>, transform_indices = @transform_10, window_bounds = array<i64: 32, 32>}, {pipeline_mode = #tpu.pipeline_mode<synchronous>, transform_indices = @transform_11, window_bounds = array<i64: 1, 32>}, {pipeline_mode = #tpu.pipeline_mode<synchronous>, transform_indices = @transform_12, window_bounds = array<i64: 32, 32>}, {pipeline_mode = #tpu.pipeline_mode<synchronous>, transform_indices = @transform_13, window_bounds = array<i64: 1, 32>}, {pipeline_mode = #tpu.pipeline_mode<synchronous>, transform_indices = @transform_14, window_bounds = array<i64: 32, 32>}, {pipeline_mode = #tpu.pipeline_mode<synchronous>, transform_indices = @transform_15, window_bounds = array<i64: 1, 32>}, {pipeline_mode = #tpu.pipeline_mode<synchronous>, transform_indices = @transform_16, window_bounds = array<i64: 1, 32>}, {pipeline_mode = #tpu.pipeline_mode<synchronous>, transform_indices = @transform_17, window_bounds = array<i64: 32, 64>}, {pipeline_mode = #tpu.pipeline_mode<synchronous>, transform_indices = @transform_18, window_bounds = array<i64: 1, 64>}, {pipeline_mode = #tpu.pipeline_mode<synchronous>, transform_indices = @transform_19, window_bounds = array<i64: 32, 64>}, {pipeline_mode = #tpu.pipeline_mode<synchronous>, transform_indices = @transform_20, window_bounds = array<i64: 1, 64>}, {pipeline_mode = #tpu.pipeline_mode<synchronous>, transform_indices = @transform_21, window_bounds = array<i64: 64, 32>}, {pipeline_mode = #tpu.pipeline_mode<synchronous>, transform_indices = @transform_22, window_bounds = array<i64: 1, 32>}, {transform_indices = @transform_23, window_bounds = array<i64: 1, 8, 32>}]} {
    %c0 = arith.constant 0 : index
    %c0_0 = arith.constant 0 : index
    %c0_1 = arith.constant 0 : index
    %0 = vector.load %arg1[%c0, %c0_0, %c0_1] : memref<1x8x32xf32, #tpu.memory_space<vmem>>, vector<1x8x32xf32>
    %1 = vector.shape_cast %0 : vector<1x8x32xf32> to vector<8x32xf32>
    %c0_2 = arith.constant 0 : index
    %c0_3 = arith.constant 0 : index
    %c0_4 = arith.constant 0 : index
    %2 = vector.load %arg2[%c0_2, %c0_3, %c0_4] : memref<1x8x1xf32, #tpu.memory_space<vmem>>, vector<1x8x1xf32>
    %3 = vector.shape_cast %2 : vector<1x8x1xf32> to vector<8x1xf32>
    %cst = arith.constant 1.000000e+00 : f32
    %4 = vector.broadcast %cst : f32 to vector<8x1xf32>
    %5 = arith.subf %4, %3 : vector<8x1xf32>
    %c0_5 = arith.constant 0 : index
    %c0_6 = arith.constant 0 : index
    %6 = vector.load %arg3[%c0_5, %c0_6] : memref<1x32xf32, #tpu.memory_space<vmem>>, vector<1x32xf32>
    %7 = arith.mulf %1, %1 : vector<8x32xf32>
    %cst_7 = arith.constant dense<0.000000e+00> : vector<8xf32>
    %8 = vector.multi_reduction <add>, %7, %cst_7 [1] : vector<8x32xf32> to vector<8xf32>
    %9 = vector.shape_cast %8 : vector<8xf32> to vector<8x1xf32>
    %cst_8 = arith.constant 3.200000e+01 : f32
    %10 = vector.broadcast %cst_8 : f32 to vector<8x1xf32>
    %11 = arith.divf %9, %10 : vector<8x1xf32>
    %cst_9 = arith.constant 9.99999997E-7 : f32
    %12 = vector.broadcast %cst_9 : f32 to vector<8x1xf32>
    %13 = arith.addf %11, %12 : vector<8x1xf32>
    %14 = math.rsqrt %13 : vector<8x1xf32>
    %15 = vector.broadcast %14 : vector<8x1xf32> to vector<8x32xf32>
    %16 = arith.mulf %1, %15 : vector<8x32xf32>
    %cst_10 = arith.constant 1.000000e+00 : f32
    %17 = vector.broadcast %cst_10 : f32 to vector<1x32xf32>
    %18 = arith.addf %6, %17 : vector<1x32xf32>
    %19 = vector.broadcast %18 : vector<1x32xf32> to vector<8x32xf32>
    %20 = arith.mulf %16, %19 : vector<8x32xf32>
    %c0_11 = arith.constant 0 : index
    %c0_12 = arith.constant 0 : index
    %21 = vector.load %arg4[%c0_11, %c0_12] : memref<32x32xf32, #tpu.memory_space<vmem>>, vector<32x32xf32>
    %cst_13 = arith.constant dense<0.000000e+00> : vector<8x32xf32>
    %22 = tpu.matmul %20, %21, %cst_13 {dimension_numbers = #tpu.dot_dimension_numbers<[1], [0], [0], [1], [0, 0, 1, 1], [], []>} : vector<8x32xf32>, vector<32x32xf32>, vector<8x32xf32> -> vector<8x32xf32>
    %c0_14 = arith.constant 0 : index
    %c0_15 = arith.constant 0 : index
    %23 = vector.load %arg5[%c0_14, %c0_15] : memref<1x32xf32, #tpu.memory_space<vmem>>, vector<1x32xf32>
    %24 = vector.broadcast %23 : vector<1x32xf32> to vector<8x32xf32>
    %25 = arith.addf %22, %24 : vector<8x32xf32>
    %cst_16 = arith.constant 5.000000e-01 : f32
    %26 = vector.broadcast %cst_16 : f32 to vector<8x32xf32>
    %27 = arith.mulf %26, %25 : vector<8x32xf32>
    %cst_17 = arith.constant 4.471500e-02 : f32
    %28 = vector.broadcast %cst_17 : f32 to vector<8x32xf32>
    %29 = arith.mulf %28, %25 : vector<8x32xf32>
    %30 = arith.mulf %29, %25 : vector<8x32xf32>
    %31 = arith.mulf %30, %25 : vector<8x32xf32>
    %32 = arith.addf %25, %31 : vector<8x32xf32>
    %cst_18 = arith.constant 0.797884583 : f32
    %33 = vector.broadcast %cst_18 : f32 to vector<8x32xf32>
    %34 = arith.mulf %33, %32 : vector<8x32xf32>
    %35 = math.tanh %34 : vector<8x32xf32>
    %cst_19 = arith.constant 1.000000e+00 : f32
    %36 = vector.broadcast %cst_19 : f32 to vector<8x32xf32>
    %37 = arith.addf %36, %35 : vector<8x32xf32>
    %38 = arith.mulf %27, %37 : vector<8x32xf32>
    %c0_20 = arith.constant 0 : index
    %c0_21 = arith.constant 0 : index
    %39 = vector.load %arg6[%c0_20, %c0_21] : memref<32x32xf32, #tpu.memory_space<vmem>>, vector<32x32xf32>
    %cst_22 = arith.constant dense<0.000000e+00> : vector<8x32xf32>
    %40 = tpu.matmul %20, %39, %cst_22 {dimension_numbers = #tpu.dot_dimension_numbers<[1], [0], [0], [1], [0, 0, 1, 1], [], []>} : vector<8x32xf32>, vector<32x32xf32>, vector<8x32xf32> -> vector<8x32xf32>
    %c0_23 = arith.constant 0 : index
    %c0_24 = arith.constant 0 : index
    %41 = vector.load %arg7[%c0_23, %c0_24] : memref<1x32xf32, #tpu.memory_space<vmem>>, vector<1x32xf32>
    %42 = vector.broadcast %41 : vector<1x32xf32> to vector<8x32xf32>
    %43 = arith.addf %40, %42 : vector<8x32xf32>
    %c0_25 = arith.constant 0 : index
    %c0_26 = arith.constant 0 : index
    %44 = vector.load %arg8[%c0_25, %c0_26] : memref<4x32xf32, #tpu.memory_space<vmem>>, vector<4x32xf32>
    %45 = vector.extract_strided_slice %44 {offsets = [3, 0], sizes = [1, 32], strides = [1, 1]} : vector<4x32xf32> to vector<1x32xf32>
    %46 = vector.broadcast %45 : vector<1x32xf32> to vector<8x32xf32>
    %47 = arith.mulf %43, %46 : vector<8x32xf32>
    %cst_27 = arith.constant 0.000000e+00 : f32
    %48 = vector.broadcast %cst_27 : f32 to vector<1x32xf32>
    %49 = vector.extract_strided_slice %43 {offsets = [0, 0], sizes = [7, 32], strides = [1, 1]} : vector<8x32xf32> to vector<7x32xf32>
    %50 = tpu.concatenate %48, %49 in 0 : vector<1x32xf32>, vector<7x32xf32> -> vector<8x32xf32>
    %51 = vector.broadcast %5 : vector<8x1xf32> to vector<8x32xf32>
    %52 = arith.mulf %50, %51 : vector<8x32xf32>
    %53 = vector.extract_strided_slice %44 {offsets = [2, 0], sizes = [1, 32], strides = [1, 1]} : vector<4x32xf32> to vector<1x32xf32>
    %54 = vector.broadcast %53 : vector<1x32xf32> to vector<8x32xf32>
    %55 = arith.mulf %52, %54 : vector<8x32xf32>
    %56 = arith.addf %47, %55 : vector<8x32xf32>
    %cst_28 = arith.constant 0.000000e+00 : f32
    %57 = vector.broadcast %cst_28 : f32 to vector<1x32xf32>
    %58 = vector.extract_strided_slice %50 {offsets = [0, 0], sizes = [7, 32], strides = [1, 1]} : vector<8x32xf32> to vector<7x32xf32>
    %59 = tpu.concatenate %57, %58 in 0 : vector<1x32xf32>, vector<7x32xf32> -> vector<8x32xf32>
    %cst_29 = arith.constant 1.000000e+00 : f32
    %60 = vector.broadcast %cst_29 : f32 to vector<1x1xf32>
    %61 = vector.extract_strided_slice %5 {offsets = [0, 0], sizes = [7, 1], strides = [1, 1]} : vector<8x1xf32> to vector<7x1xf32>
    %62 = tpu.concatenate %60, %61 in 0 : vector<1x1xf32>, vector<7x1xf32> -> vector<8x1xf32>
    %63 = arith.mulf %5, %62 : vector<8x1xf32>
    %64 = vector.broadcast %63 : vector<8x1xf32> to vector<8x32xf32>
    %65 = arith.mulf %59, %64 : vector<8x32xf32>
    %66 = vector.extract_strided_slice %44 {offsets = [1, 0], sizes = [1, 32], strides = [1, 1]} : vector<4x32xf32> to vector<1x32xf32>
    %67 = vector.broadcast %66 : vector<1x32xf32> to vector<8x32xf32>
    %68 = arith.mulf %65, %67 : vector<8x32xf32>
    %69 = arith.addf %56, %68 : vector<8x32xf32>
    %cst_30 = arith.constant 0.000000e+00 : f32
    %70 = vector.broadcast %cst_30 : f32 to vector<1x32xf32>
    %71 = vector.extract_strided_slice %59 {offsets = [0, 0], sizes = [7, 32], strides = [1, 1]} : vector<8x32xf32> to vector<7x32xf32>
    %72 = tpu.concatenate %70, %71 in 0 : vector<1x32xf32>, vector<7x32xf32> -> vector<8x32xf32>
    %cst_31 = arith.constant 1.000000e+00 : f32
    %73 = vector.broadcast %cst_31 : f32 to vector<1x1xf32>
    %74 = vector.extract_strided_slice %63 {offsets = [0, 0], sizes = [7, 1], strides = [1, 1]} : vector<8x1xf32> to vector<7x1xf32>
    %75 = tpu.concatenate %73, %74 in 0 : vector<1x1xf32>, vector<7x1xf32> -> vector<8x1xf32>
    %76 = arith.mulf %5, %75 : vector<8x1xf32>
    %77 = vector.broadcast %76 : vector<8x1xf32> to vector<8x32xf32>
    %78 = arith.mulf %72, %77 : vector<8x32xf32>
    %79 = vector.extract_strided_slice %44 {offsets = [0, 0], sizes = [1, 32], strides = [1, 1]} : vector<4x32xf32> to vector<1x32xf32>
    %80 = vector.broadcast %79 : vector<1x32xf32> to vector<8x32xf32>
    %81 = arith.mulf %78, %80 : vector<8x32xf32>
    %82 = arith.addf %69, %81 : vector<8x32xf32>
    %c0_32 = arith.constant 0 : index
    %c0_33 = arith.constant 0 : index
    %83 = vector.load %arg9[%c0_32, %c0_33] : memref<1x32xf32, #tpu.memory_space<vmem>>, vector<1x32xf32>
    %84 = vector.broadcast %83 : vector<1x32xf32> to vector<8x32xf32>
    %85 = arith.addf %82, %84 : vector<8x32xf32>
    %c0_34 = arith.constant 0 : index
    %c0_35 = arith.constant 0 : index
    %86 = vector.load %arg11[%c0_34, %c0_35] : memref<32x32xf32, #tpu.memory_space<vmem>>, vector<32x32xf32>
    %cst_36 = arith.constant dense<0.000000e+00> : vector<8x32xf32>
    %87 = tpu.matmul %85, %86, %cst_36 {dimension_numbers = #tpu.dot_dimension_numbers<[1], [0], [0], [1], [0, 0, 1, 1], [], []>} : vector<8x32xf32>, vector<32x32xf32>, vector<8x32xf32> -> vector<8x32xf32>
    %c0_37 = arith.constant 0 : index
    %c0_38 = arith.constant 0 : index
    %88 = vector.load %arg12[%c0_37, %c0_38] : memref<1x32xf32, #tpu.memory_space<vmem>>, vector<1x32xf32>
    %89 = vector.broadcast %88 : vector<1x32xf32> to vector<8x32xf32>
    %90 = arith.addf %87, %89 : vector<8x32xf32>
    %91 = arith.negf %90 : vector<8x32xf32>
    %92 = math.exp %91 : vector<8x32xf32>
    %cst_39 = arith.constant 1.000000e+00 : f32
    %93 = vector.broadcast %cst_39 : f32 to vector<8x32xf32>
    %94 = arith.addf %93, %92 : vector<8x32xf32>
    %95 = arith.divf %93, %94 : vector<8x32xf32>
    %c0_40 = arith.constant 0 : index
    %c0_41 = arith.constant 0 : index
    %96 = vector.load %arg13[%c0_40, %c0_41] : memref<32x32xf32, #tpu.memory_space<vmem>>, vector<32x32xf32>
    %cst_42 = arith.constant dense<0.000000e+00> : vector<8x32xf32>
    %97 = tpu.matmul %85, %96, %cst_42 {dimension_numbers = #tpu.dot_dimension_numbers<[1], [0], [0], [1], [0, 0, 1, 1], [], []>} : vector<8x32xf32>, vector<32x32xf32>, vector<8x32xf32> -> vector<8x32xf32>
    %c0_43 = arith.constant 0 : index
    %c0_44 = arith.constant 0 : index
    %98 = vector.load %arg14[%c0_43, %c0_44] : memref<1x32xf32, #tpu.memory_space<vmem>>, vector<1x32xf32>
    %99 = vector.broadcast %98 : vector<1x32xf32> to vector<8x32xf32>
    %100 = arith.addf %97, %99 : vector<8x32xf32>
    %101 = arith.negf %100 : vector<8x32xf32>
    %102 = math.exp %101 : vector<8x32xf32>
    %cst_45 = arith.constant 1.000000e+00 : f32
    %103 = vector.broadcast %cst_45 : f32 to vector<8x32xf32>
    %104 = arith.addf %103, %102 : vector<8x32xf32>
    %105 = arith.divf %103, %104 : vector<8x32xf32>
    %c0_46 = arith.constant 0 : index
    %c0_47 = arith.constant 0 : index
    %106 = vector.load %arg10[%c0_46, %c0_47] : memref<1x32xf32, #tpu.memory_space<vmem>>, vector<1x32xf32>
    %107 = vector.broadcast %106 : vector<1x32xf32> to vector<8x32xf32>
    %108 = arith.mulf %105, %107 : vector<8x32xf32>
    %109 = math.exp %108 : vector<8x32xf32>
    %110 = arith.mulf %109, %109 : vector<8x32xf32>
    %cst_48 = arith.constant 1.000000e+00 : f32
    %111 = vector.broadcast %cst_48 : f32 to vector<8x32xf32>
    %112 = arith.subf %111, %110 : vector<8x32xf32>
    %113 = math.sqrt %112 : vector<8x32xf32>
    %114 = vector.broadcast %5 : vector<8x1xf32> to vector<8x32xf32>
    %115 = arith.mulf %114, %113 : vector<8x32xf32>
    %116 = vector.broadcast %3 : vector<8x1xf32> to vector<8x32xf32>
    %117 = arith.addf %116, %115 : vector<8x32xf32>
    %118 = arith.mulf %85, %95 : vector<8x32xf32>
    %119 = arith.mulf %118, %117 : vector<8x32xf32>
    %120 = vector.broadcast %5 : vector<8x1xf32> to vector<8x32xf32>
    %121 = arith.mulf %109, %120 : vector<8x32xf32>
    %cst_49 = arith.constant 1.000000e+00 : f32
    %122 = vector.broadcast %cst_49 : f32 to vector<1x32xf32>
    %123 = vector.extract_strided_slice %121 {offsets = [0, 0], sizes = [7, 32], strides = [1, 1]} : vector<8x32xf32> to vector<7x32xf32>
    %124 = tpu.concatenate %122, %123 in 0 : vector<1x32xf32>, vector<7x32xf32> -> vector<8x32xf32>
    %cst_50 = arith.constant 0.000000e+00 : f32
    %125 = vector.broadcast %cst_50 : f32 to vector<1x32xf32>
    %126 = vector.extract_strided_slice %119 {offsets = [0, 0], sizes = [7, 32], strides = [1, 1]} : vector<8x32xf32> to vector<7x32xf32>
    %127 = tpu.concatenate %125, %126 in 0 : vector<1x32xf32>, vector<7x32xf32> -> vector<8x32xf32>
    %128 = arith.mulf %121, %127 : vector<8x32xf32>
    %129 = arith.addf %128, %119 : vector<8x32xf32>
    %130 = arith.mulf %121, %124 : vector<8x32xf32>
    %cst_51 = arith.constant 1.000000e+00 : f32
    %131 = vector.broadcast %cst_51 : f32 to vector<2x32xf32>
    %132 = vector.extract_strided_slice %130 {offsets = [0, 0], sizes = [6, 32], strides = [1, 1]} : vector<8x32xf32> to vector<6x32xf32>
    %133 = tpu.concatenate %131, %132 in 0 : vector<2x32xf32>, vector<6x32xf32> -> vector<8x32xf32>
    %cst_52 = arith.constant 0.000000e+00 : f32
    %134 = vector.broadcast %cst_52 : f32 to vector<2x32xf32>
    %135 = vector.extract_strided_slice %129 {offsets = [0, 0], sizes = [6, 32], strides = [1, 1]} : vector<8x32xf32> to vector<6x32xf32>
    %136 = tpu.concatenate %134, %135 in 0 : vector<2x32xf32>, vector<6x32xf32> -> vector<8x32xf32>
    %137 = arith.mulf %130, %136 : vector<8x32xf32>
    %138 = arith.addf %137, %129 : vector<8x32xf32>
    %139 = arith.mulf %130, %133 : vector<8x32xf32>
    %cst_53 = arith.constant 0.000000e+00 : f32
    %140 = vector.broadcast %cst_53 : f32 to vector<4x32xf32>
    %141 = vector.extract_strided_slice %138 {offsets = [0, 0], sizes = [4, 32], strides = [1, 1]} : vector<8x32xf32> to vector<4x32xf32>
    %142 = tpu.concatenate %140, %141 in 0 : vector<4x32xf32>, vector<4x32xf32> -> vector<8x32xf32>
    %143 = arith.mulf %139, %142 : vector<8x32xf32>
    %144 = arith.addf %143, %138 : vector<8x32xf32>
    %145 = arith.mulf %144, %38 : vector<8x32xf32>
    %c0_54 = arith.constant 0 : index
    %c0_55 = arith.constant 0 : index
    %146 = vector.load %arg15[%c0_54, %c0_55] : memref<32x32xf32, #tpu.memory_space<vmem>>, vector<32x32xf32>
    %cst_56 = arith.constant dense<0.000000e+00> : vector<8x32xf32>
    %147 = tpu.matmul %145, %146, %cst_56 {dimension_numbers = #tpu.dot_dimension_numbers<[1], [0], [0], [1], [0, 0, 1, 1], [], []>} : vector<8x32xf32>, vector<32x32xf32>, vector<8x32xf32> -> vector<8x32xf32>
    %c0_57 = arith.constant 0 : index
    %c0_58 = arith.constant 0 : index
    %148 = vector.load %arg16[%c0_57, %c0_58] : memref<1x32xf32, #tpu.memory_space<vmem>>, vector<1x32xf32>
    %149 = vector.broadcast %148 : vector<1x32xf32> to vector<8x32xf32>
    %150 = arith.addf %147, %149 : vector<8x32xf32>
    %151 = arith.addf %150, %1 : vector<8x32xf32>
    %c0_59 = arith.constant 0 : index
    %c0_60 = arith.constant 0 : index
    %152 = vector.load %arg17[%c0_59, %c0_60] : memref<1x32xf32, #tpu.memory_space<vmem>>, vector<1x32xf32>
    %153 = arith.mulf %151, %151 : vector<8x32xf32>
    %cst_61 = arith.constant dense<0.000000e+00> : vector<8xf32>
    %154 = vector.multi_reduction <add>, %153, %cst_61 [1] : vector<8x32xf32> to vector<8xf32>
    %155 = vector.shape_cast %154 : vector<8xf32> to vector<8x1xf32>
    %cst_62 = arith.constant 3.200000e+01 : f32
    %156 = vector.broadcast %cst_62 : f32 to vector<8x1xf32>
    %157 = arith.divf %155, %156 : vector<8x1xf32>
    %cst_63 = arith.constant 9.99999997E-7 : f32
    %158 = vector.broadcast %cst_63 : f32 to vector<8x1xf32>
    %159 = arith.addf %157, %158 : vector<8x1xf32>
    %160 = math.rsqrt %159 : vector<8x1xf32>
    %161 = vector.broadcast %160 : vector<8x1xf32> to vector<8x32xf32>
    %162 = arith.mulf %151, %161 : vector<8x32xf32>
    %cst_64 = arith.constant 1.000000e+00 : f32
    %163 = vector.broadcast %cst_64 : f32 to vector<1x32xf32>
    %164 = arith.addf %152, %163 : vector<1x32xf32>
    %165 = vector.broadcast %164 : vector<1x32xf32> to vector<8x32xf32>
    %166 = arith.mulf %162, %165 : vector<8x32xf32>
    %c0_65 = arith.constant 0 : index
    %c0_66 = arith.constant 0 : index
    %167 = vector.load %arg18[%c0_65, %c0_66] : memref<32x64xf32, #tpu.memory_space<vmem>>, vector<32x64xf32>
    %c0_67 = arith.constant 0 : index
    %c0_68 = arith.constant 0 : index
    %168 = vector.load %arg19[%c0_67, %c0_68] : memref<1x64xf32, #tpu.memory_space<vmem>>, vector<1x64xf32>
    %c0_69 = arith.constant 0 : index
    %c0_70 = arith.constant 0 : index
    %169 = vector.load %arg20[%c0_69, %c0_70] : memref<32x64xf32, #tpu.memory_space<vmem>>, vector<32x64xf32>
    %c0_71 = arith.constant 0 : index
    %c0_72 = arith.constant 0 : index
    %170 = vector.load %arg21[%c0_71, %c0_72] : memref<1x64xf32, #tpu.memory_space<vmem>>, vector<1x64xf32>
    %c0_73 = arith.constant 0 : index
    %c0_74 = arith.constant 0 : index
    %171 = vector.load %arg22[%c0_73, %c0_74] : memref<64x32xf32, #tpu.memory_space<vmem>>, vector<64x32xf32>
    %c0_75 = arith.constant 0 : index
    %c0_76 = arith.constant 0 : index
    %172 = vector.load %arg23[%c0_75, %c0_76] : memref<1x32xf32, #tpu.memory_space<vmem>>, vector<1x32xf32>
    %cst_77 = arith.constant dense<0.000000e+00> : vector<8x64xf32>
    %173 = tpu.matmul %166, %167, %cst_77 {dimension_numbers = #tpu.dot_dimension_numbers<[1], [0], [0], [1], [0, 0, 1, 1], [], []>} : vector<8x32xf32>, vector<32x64xf32>, vector<8x64xf32> -> vector<8x64xf32>
    %174 = vector.broadcast %168 : vector<1x64xf32> to vector<8x64xf32>
    %175 = arith.addf %173, %174 : vector<8x64xf32>
    %cst_78 = arith.constant dense<0.000000e+00> : vector<8x64xf32>
    %176 = tpu.matmul %166, %169, %cst_78 {dimension_numbers = #tpu.dot_dimension_numbers<[1], [0], [0], [1], [0, 0, 1, 1], [], []>} : vector<8x32xf32>, vector<32x64xf32>, vector<8x64xf32> -> vector<8x64xf32>
    %177 = vector.broadcast %170 : vector<1x64xf32> to vector<8x64xf32>
    %178 = arith.addf %176, %177 : vector<8x64xf32>
    %cst_79 = arith.constant 5.000000e-01 : f32
    %179 = vector.broadcast %cst_79 : f32 to vector<8x64xf32>
    %180 = arith.mulf %179, %175 : vector<8x64xf32>
    %cst_80 = arith.constant 4.471500e-02 : f32
    %181 = vector.broadcast %cst_80 : f32 to vector<8x64xf32>
    %182 = arith.mulf %181, %175 : vector<8x64xf32>
    %183 = arith.mulf %182, %175 : vector<8x64xf32>
    %184 = arith.mulf %183, %175 : vector<8x64xf32>
    %185 = arith.addf %175, %184 : vector<8x64xf32>
    %cst_81 = arith.constant 0.797884583 : f32
    %186 = vector.broadcast %cst_81 : f32 to vector<8x64xf32>
    %187 = arith.mulf %186, %185 : vector<8x64xf32>
    %188 = math.tanh %187 : vector<8x64xf32>
    %cst_82 = arith.constant 1.000000e+00 : f32
    %189 = vector.broadcast %cst_82 : f32 to vector<8x64xf32>
    %190 = arith.addf %189, %188 : vector<8x64xf32>
    %191 = arith.mulf %180, %190 : vector<8x64xf32>
    %192 = arith.mulf %191, %178 : vector<8x64xf32>
    %cst_83 = arith.constant dense<0.000000e+00> : vector<8x32xf32>
    %193 = tpu.matmul %192, %171, %cst_83 {dimension_numbers = #tpu.dot_dimension_numbers<[1], [0], [0], [1], [0, 0, 1, 1], [], []>} : vector<8x64xf32>, vector<64x32xf32>, vector<8x32xf32> -> vector<8x32xf32>
    %194 = vector.broadcast %172 : vector<1x32xf32> to vector<8x32xf32>
    %195 = arith.addf %193, %194 : vector<8x32xf32>
    %196 = arith.addf %195, %151 : vector<8x32xf32>
    %c0_84 = arith.constant 0 : index
    %c0_85 = arith.constant 0 : index
    %c0_86 = arith.constant 0 : index
    %197 = vector.load %arg24[%c0_84, %c0_85, %c0_86] : memref<1x8x32xf32, #tpu.memory_space<vmem>>, vector<1x8x32xf32>
    %198 = vector.shape_cast %197 : vector<1x8x32xf32> to vector<8x32xf32>
    %199 = vector.shape_cast %196 : vector<8x32xf32> to vector<1x8x32xf32>
    tpu.vector_store %arg24[%c0_84, %c0_85, %c0_86], %199 {strides = array<i32>} : memref<1x8x32xf32, #tpu.memory_space<vmem>>, vector<1x8x32xf32>,
    return
  }
  func.func @transform_0(%arg0: i32) -> (i32, i32, i32) {
    %c0_i32 = arith.constant 0 : i32
    %c0_i32_0 = arith.constant 0 : i32
    %c0_i32_1 = arith.constant 0 : i32
    return %arg0, %c0_i32, %c0_i32_0 : i32, i32, i32
  }
  func.func @transform_1(%arg0: i32) -> (i32, i32, i32) {
    %c0_i32 = arith.constant 0 : i32
    %c0_i32_0 = arith.constant 0 : i32
    %c0_i32_1 = arith.constant 0 : i32
    return %arg0, %c0_i32, %c0_i32_0 : i32, i32, i32
  }
  func.func @transform_2(%arg0: i32) -> (i32, i32) {
    %c0_i32 = arith.constant 0 : i32
    %c0_i32_0 = arith.constant 0 : i32
    %c0_i32_1 = arith.constant 0 : i32
    return %c0_i32, %c0_i32_0 : i32, i32
  }
  func.func @transform_3(%arg0: i32) -> (i32, i32) {
    %c0_i32 = arith.constant 0 : i32
    %c0_i32_0 = arith.constant 0 : i32
    %c0_i32_1 = arith.constant 0 : i32
    return %c0_i32, %c0_i32_0 : i32, i32
  }
  func.func @transform_4(%arg0: i32) -> (i32, i32) {
    %c0_i32 = arith.constant 0 : i32
    %c0_i32_0 = arith.constant 0 : i32
    %c0_i32_1 = arith.constant 0 : i32
    return %c0_i32, %c0_i32_0 : i32, i32
  }
  func.func @transform_5(%arg0: i32) -> (i32, i32) {
    %c0_i32 = arith.constant 0 : i32
    %c0_i32_0 = arith.constant 0 : i32
    %c0_i32_1 = arith.constant 0 : i32
    return %c0_i32, %c0_i32_0 : i32, i32
  }
  func.func @transform_6(%arg0: i32) -> (i32, i32) {
    %c0_i32 = arith.constant 0 : i32
    %c0_i32_0 = arith.constant 0 : i32
    %c0_i32_1 = arith.constant 0 : i32
    return %c0_i32, %c0_i32_0 : i32, i32
  }
  func.func @transform_7(%arg0: i32) -> (i32, i32) {
    %c0_i32 = arith.constant 0 : i32
    %c0_i32_0 = arith.constant 0 : i32
    %c0_i32_1 = arith.constant 0 : i32
    return %c0_i32, %c0_i32_0 : i32, i32
  }
  func.func @transform_8(%arg0: i32) -> (i32, i32) {
    %c0_i32 = arith.constant 0 : i32
    %c0_i32_0 = arith.constant 0 : i32
    %c0_i32_1 = arith.constant 0 : i32
    return %c0_i32, %c0_i32_0 : i32, i32
  }
  func.func @transform_9(%arg0: i32) -> (i32, i32) {
    %c0_i32 = arith.constant 0 : i32
    %c0_i32_0 = arith.constant 0 : i32
    %c0_i32_1 = arith.constant 0 : i32
    return %c0_i32, %c0_i32_0 : i32, i32
  }
  func.func @transform_10(%arg0: i32) -> (i32, i32) {
    %c0_i32 = arith.constant 0 : i32
    %c0_i32_0 = arith.constant 0 : i32
    %c0_i32_1 = arith.constant 0 : i32
    return %c0_i32, %c0_i32_0 : i32, i32
  }
  func.func @transform_11(%arg0: i32) -> (i32, i32) {
    %c0_i32 = arith.constant 0 : i32
    %c0_i32_0 = arith.constant 0 : i32
    %c0_i32_1 = arith.constant 0 : i32
    return %c0_i32, %c0_i32_0 : i32, i32
  }
  func.func @transform_12(%arg0: i32) -> (i32, i32) {
    %c0_i32 = arith.constant 0 : i32
    %c0_i32_0 = arith.constant 0 : i32
    %c0_i32_1 = arith.constant 0 : i32
    return %c0_i32, %c0_i32_0 : i32, i32
  }
  func.func @transform_13(%arg0: i32) -> (i32, i32) {
    %c0_i32 = arith.constant 0 : i32
    %c0_i32_0 = arith.constant 0 : i32
    %c0_i32_1 = arith.constant 0 : i32
    return %c0_i32, %c0_i32_0 : i32, i32
  }
  func.func @transform_14(%arg0: i32) -> (i32, i32) {
    %c0_i32 = arith.constant 0 : i32
    %c0_i32_0 = arith.constant 0 : i32
    %c0_i32_1 = arith.constant 0 : i32
    return %c0_i32, %c0_i32_0 : i32, i32
  }
  func.func @transform_15(%arg0: i32) -> (i32, i32) {
    %c0_i32 = arith.constant 0 : i32
    %c0_i32_0 = arith.constant 0 : i32
    %c0_i32_1 = arith.constant 0 : i32
    return %c0_i32, %c0_i32_0 : i32, i32
  }
  func.func @transform_16(%arg0: i32) -> (i32, i32) {
    %c0_i32 = arith.constant 0 : i32
    %c0_i32_0 = arith.constant 0 : i32
    %c0_i32_1 = arith.constant 0 : i32
    return %c0_i32, %c0_i32_0 : i32, i32
  }
  func.func @transform_17(%arg0: i32) -> (i32, i32) {
    %c0_i32 = arith.constant 0 : i32
    %c0_i32_0 = arith.constant 0 : i32
    %c0_i32_1 = arith.constant 0 : i32
    return %c0_i32, %c0_i32_0 : i32, i32
  }
  func.func @transform_18(%arg0: i32) -> (i32, i32) {
    %c0_i32 = arith.constant 0 : i32
    %c0_i32_0 = arith.constant 0 : i32
    %c0_i32_1 = arith.constant 0 : i32
    return %c0_i32, %c0_i32_0 : i32, i32
  }
  func.func @transform_19(%arg0: i32) -> (i32, i32) {
    %c0_i32 = arith.constant 0 : i32
    %c0_i32_0 = arith.constant 0 : i32
    %c0_i32_1 = arith.constant 0 : i32
    return %c0_i32, %c0_i32_0 : i32, i32
  }
  func.func @transform_20(%arg0: i32) -> (i32, i32) {
    %c0_i32 = arith.constant 0 : i32
    %c0_i32_0 = arith.constant 0 : i32
    %c0_i32_1 = arith.constant 0 : i32
    return %c0_i32, %c0_i32_0 : i32, i32
  }
  func.func @transform_21(%arg0: i32) -> (i32, i32) {
    %c0_i32 = arith.constant 0 : i32
    %c0_i32_0 = arith.constant 0 : i32
    %c0_i32_1 = arith.constant 0 : i32
    return %c0_i32, %c0_i32_0 : i32, i32
  }
  func.func @transform_22(%arg0: i32) -> (i32, i32) {
    %c0_i32 = arith.constant 0 : i32
    %c0_i32_0 = arith.constant 0 : i32
    %c0_i32_1 = arith.constant 0 : i32
    return %c0_i32, %c0_i32_0 : i32, i32
  }
  func.func @transform_23(%arg0: i32) -> (i32, i32, i32) {
    %c0_i32 = arith.constant 0 : i32
    %c0_i32_0 = arith.constant 0 : i32
    %c0_i32_1 = arith.constant 0 : i32
    return %arg0, %c0_i32, %c0_i32_0 : i32, i32, i32
  }
}

</mosaic_0001>

<bundles_post_ra>
// kernel: tpu_custom_call.1
= control target key start
LH: loop header
LB: loop body
LE: loop exit
PB: predicated region body
PF: predicated region fallthrough
CT: control target
= control target key end

     0   :  { %s3309_s0 = inlined_call_operand.hbm [shape: f32[2,8,32], index: 0, kind: input, shape index: {}]   ;;  %s3310_s1 = inlined_call_operand.vmem [shape: f32[2,8,1], index: 1, kind: input, shape index: {}]   ;;  %s3311_s2 = inlined_call_operand.vmem [shape: f32[1,32], index: 2, kind: input, shape index: {}]   ;;  %s3312_s3 = inlined_call_operand.vmem [shape: f32[32,32], index: 3, kind: input, shape index: {}]   ;;  %s3313_s4 = inlined_call_operand.vmem [shape: f32[1,32], index: 4, kind: input, shape index: {}]   ;;  %s3314_s5 = inlined_call_operand.vmem [shape: f32[32,32], index: 5, kind: input, shape index: {}]   ;;  %s3315_s6 = inlined_call_operand.vmem [shape: f32[1,32], index: 6, kind: input, shape index: {}]   ;;  %s3316_s7 = inlined_call_operand.hbm [shape: f32[4,32], index: 7, kind: input, shape index: {}]   ;;  %s3317_s8 = inlined_call_operand.hbm [shape: f32[1,32], index: 8, kind: input, shape index: {}]   ;;  %s3318_s9 = inlined_call_operand.hbm [shape: f32[1,32], index: 9, kind: input, shape index: {}]   ;;  %s3319_s10 = inlined_call_operand.vmem [shape: f32[32,32], index: 10, kind: input, shape index: {}]   ;;  %s3320_s11 = inlined_call_operand.hbm [shape: f32[1,32], index: 11, kind: input, shape index: {}]   ;;  %s3321_s12 = inlined_call_operand.hbm [shape: f32[32,32], index: 12, kind: input, shape index: {}]   ;;  %s3322_s13 = inlined_call_operand.hbm [shape: f32[1,32], index: 13, kind: input, shape index: {}]   ;;  %s3323_s14 = inlined_call_operand.vmem [shape: f32[32,32], index: 14, kind: input, shape index: {}]   ;;  %s3324_s15 = inlined_call_operand.vmem [shape: f32[1,32], index: 15, kind: input, shape index: {}]   ;;  %s3325_s16 = inlined_call_operand.vmem [shape: f32[1,32], index: 16, kind: input, shape index: {}]   ;;  %s3326_s17 = inlined_call_operand.hbm [shape: f32[32,64], index: 17, kind: input, shape index: {}]   ;;  %s3327_s18 = inlined_call_operand.vmem [shape: f32[1,64], index: 18, kind: input, shape index: {}]   ;;  %s3328_s19 = inlined_call_operand.hbm [shape: f32[32,64], index: 19, kind: input, shape index: {}]   ;;  %s3329_s20 = inlined_call_operand.vmem [shape: f32[1,64], index: 20, kind: input, shape index: {}]   ;;  %s3330_s21 = inlined_call_operand.vmem [shape: f32[64,32], index: 21, kind: input, shape index: {}]   ;;  %s3331_s22 = inlined_call_operand.vmem [shape: f32[1,32], index: 22, kind: input, shape index: {}]   ;;  %s3332_s23 = inlined_call_operand.hbm [shape: f32[2,8,32], index: 23, kind: output, shape index: {}]  }
   0x1   :  { %3347 = sst [smem:[#allocation24_spill]] %s3309_s0 }
   0x2   :  { %3348 = sst [smem:[#allocation25_spill]] %s3310_s1 }
   0x3   :  { %3349 = sst [smem:[#allocation26_spill]] %s3311_s2 }
   0x4   :  { %3350 = sst [smem:[#allocation27_spill]] %s3312_s3 }
   0x5   :  { %3351 = sst [smem:[#allocation28_spill]] %s3313_s4 }
   0x6   :  { %3352 = sst [smem:[#allocation29_spill]] %s3314_s5 }
   0x7   :  { %3353 = sst [smem:[#allocation30_spill]] %s3315_s6 }
   0x8   :  { %3354 = sst [smem:[#allocation31_spill]] %s3316_s7 }
   0x9   :  { %3355 = sst [smem:[#allocation32_spill]] %s3318_s9 }
   0xa   :  { %3356 = sst [smem:[#allocation33_spill]] %s3323_s14 }
   0xb   :  { %3357 = sst [smem:[#allocation34_spill]] %s3324_s15 }
   0xc   :  { %3358 = sst [smem:[#allocation35_spill]] %s3325_s16 }
   0xd   :  { %3359 = sst [smem:[#allocation36_spill]] %s3327_s18 }
   0xe   :  { %3360 = sst [smem:[#allocation37_spill]] %s3329_s20 }
   0xf   :  { %3361 = sst [smem:[#allocation38_spill]] %s3330_s21 }
  0x10   :  { %3362 = sst [smem:[#allocation39_spill]] %s3331_s22 }
  0x11   :  { %3363 = sst [smem:[#allocation40_spill]] %s3332_s23 }
  0x12   :  { %28 = vsyncpa [#allocation3], 0 }
  0x13   :  { %30 = vsyncpa [#allocation3 + $0x1], 0 }
  0x14   :  { %31 = vsyncpa [#allocation6], 0 }
  0x15   :  { %32 = vsyncpa [#allocation9], 0 }
  0x16   :  { %33 = vsyncpa [#allocation12], 0 }
  0x17   :  { %34 = vsyncpa [#allocation15], 0 }
  0x18   :  { %35 = vsyncpa [#allocation4], 0 }
  0x19   :  { %37 = vsyncpa [#allocation4 + $0x1], 0  ;;  %s2765_s4 = smov 0   ;;  %s2767_s30 = smov 0  }
  0x1a   :  { %s2769_s24 = smov 0   ;;  %s2771_s25 = smov 0  }
  0x1b LB: > { %s2629_s5 = smov [#allocation5]   ;;  %s2786_s26 = sadd.s32 4294967295, %s2627_s25   ;;  %s2627_s25 = sphi %s2771_s25, %s3406_s25   ;;  %s2623_s24 = sphi %s2769_s24, %s3405_s24   ;;  %s2619_s30 = sphi %s2767_s30, %s3404_s30   ;;  %s2615_s4 = sphi %s2765_s4, %s3403_s4  }
  0x1c   : > { %s595_s1 = sshll.u32 %s2629_s5, 4  ;;  %p1894_p0 = scmp.ge.s32.totalorder %s2627_s25, 1  ;;  %s596_s1 = int_to_ptr.vmem [resolvable:$true] %s595_s1 }
  0x1d   : > { %p3338_p1 = scmp.eq.s32.totalorder %s2786_s26, 0  ;;  %p567_p2 = scmp.lt.s32.totalorder %s2627_s25, 3 }
  0x1e   : > { %s2630_s6 = smov [#allocation8]   ;;  %s2631_s7 = smov [#allocation11]  }
  0x1f   : > { %p2791_p3 = pnand %p1894_p0, %p567_p2  ;;  %s617_s27 = sshll.u32 %s2630_s6, 4  ;;  %s2798_s27 = int_to_ptr.vmem [resolvable:$true] %s617_s27 }
  0x20   : > { %s641_s28 = sshll.u32 %s2631_s7, 4  ;;  %s3366_s5 = sld [smem:[#allocation31_spill]]  ;;  %s2806_s28 = int_to_ptr.vmem [resolvable:$true] %s641_s28 }
  0x21   : > { %s3364_s2 = scalar_select %p2791_p3, 1, 0 }
  0x22   : > { %p2172_p5 = pneg %p2791_p3 }
  0x24   : > { %p2802_p6 = pnand %p2172_p5, %p3338_p1 }
  0x26   : > { %s2291_s23 = scalar_lea.hbm %s3366_s5, 64  ;;  %p2816_p8 = pneg %p2802_p6 }
  0x27   : > { %p2292_p7 = scmp.ne.s32.totalorder %s3366_s5, %s2291_s23  ;;  %p2298_p11 = scmp.lt.u32.totalorder %s2291_s23, %s3366_s5 }
  0x29   : > { %p2294_p9 = pnand %p2816_p8, %p2292_p7 }
  0x2b   : > { %p2295_p10 = pneg %p2294_p9 }
  0x2d   : > { %p2300_p12 = pnand %p2298_p11, %p2295_p10 }
  0x2f   : > { %2303 = shalt.err (!%p2300_p12)
}
  0x30   : > { %s2304_s3 = scalar_lea.vmem %s596_s1, 64  ;;  %p2312_p5 = scmp.lt.s32.totalorder %s596_s1, %s596_s1 }
  0x31   : > { %p2305_p13 = scmp.ne.s32.totalorder %s596_s1, %s2304_s3  ;;  %p2313_p4 = scmp.lt.s32.totalorder %s2304_s3, %s2304_s3 }
  0x33   : > { %p2307_p0 = pnand %p2305_p13, %p2816_p8  ;;  %p2314_p1 = por %p2313_p4, %p2312_p5 }
  0x35   : > { %p2308_p2 = pneg %p2307_p0 }
  0x37   : > { %p2315_p3 = pnand %p2314_p1, %p2308_p2 }
  0x39   : > { %2318 = shalt.err (!%p2315_p3)
}
  0x3a   : > { %2175 = dma.hbm_to_vmem [thread:$0]  (!%p2802_p6), %s3366_s5, 64, %s596_s1, [#allocation6]  }
  0x3b   : > { %s3368_s9 = sld [smem:[#allocation32_spill]] }
  0x41   : > { %s2319_s0 = scalar_lea.hbm %s3368_s9, 16 }
  0x42   : > { %p2320_p7 = scmp.ne.s32.totalorder %s3368_s9, %s2319_s0  ;;  %p2326_p1 = scmp.lt.u32.totalorder %s2319_s0, %s3368_s9 }
  0x44   : > { %p2322_p9 = pnand %p2320_p7, %p2816_p8 }
  0x46   : > { %p2323_p4 = pneg %p2322_p9 }
  0x48   : > { %p2328_p3 = pnand %p2326_p1, %p2323_p4 }
  0x4a   : > { %2331 = shalt.err (!%p2328_p3)
}
  0x4b   : > { %s2332_s1 = scalar_lea.vmem %s2798_s27, 16  ;;  %s2339_s21 = scalar_lea.vmem %s2798_s27, 32 }
  0x4c   : > { %p2333_p10 = scmp.ne.s32.totalorder %s2798_s27, %s2332_s1  ;;  %p2340_p13 = scmp.lt.s32.totalorder %s2798_s27, %s2798_s27 }
  0x4d   : > { %p2341_p0 = scmp.lt.s32.totalorder %s2339_s21, %s2332_s1 }
  0x4e   : > { %p2335_p11 = pnand %p2333_p10, %p2816_p8 }
  0x4f   : > { %p2342_p2 = por %p2341_p0, %p2340_p13 }
  0x50   : > { %p2336_p12 = pneg %p2335_p11 }
  0x52   : > { %p2343_p5 = pnand %p2342_p2, %p2336_p12 }
  0x54   : > { %2346 = shalt.err (!%p2343_p5)
}
  0x55   : > { %2181 = dma.hbm_to_vmem [thread:$0]  (!%p2802_p6), %s3368_s9, 16, %s2798_s27, [#allocation9]  }
  0x56   : > { %s2347_s23 = scalar_lea.hbm %s3321_s12, 512 }
  0x57   : > { %p2348_p7 = scmp.ne.s32.totalorder %s3321_s12, %s2347_s23  ;;  %p2354_p1 = scmp.lt.u32.totalorder %s2347_s23, %s3321_s12 }
  0x59   : > { %p2350_p9 = pnand %p2348_p7, %p2816_p8 }
  0x5b   : > { %p2351_p4 = pneg %p2350_p9 }
  0x5d   : > { %p2356_p3 = pnand %p2354_p1, %p2351_p4 }
  0x5f   : > { %2359 = shalt.err (!%p2356_p3)
}
  0x60   : > { %s2360_s27 = scalar_lea.vmem %s2806_s28, 512  ;;  %p2368_p13 = scmp.lt.s32.totalorder %s2806_s28, %s2806_s28 }
  0x61   : > { %p2361_p10 = scmp.ne.s32.totalorder %s2806_s28, %s2360_s27  ;;  %p2369_p0 = scmp.lt.s32.totalorder %s2360_s27, %s2360_s27 }
  0x63   : > { %p2363_p11 = pnand %p2361_p10, %p2816_p8  ;;  %p2370_p2 = por %p2369_p0, %p2368_p13 }
  0x65   : > { %p2364_p12 = pneg %p2363_p11 }
  0x67   : > { %p2371_p5 = pnand %p2370_p2, %p2364_p12 }
  0x69   : > { %2374 = shalt.err (!%p2371_p5)
}
  0x6a   : > { %s2632_s21 = smov 128   ;;  %s2633_s16 = smov 8  }
  0x6b   : > { %2187 = dma.hbm_to_vmem [thread:$0]  (!%p2802_p6), %s3321_s12, 512, %s2806_s28, [#allocation12], %s2632_s21, %s2632_s21, %s2633_s16  }
  0x6c   : > { %s2634_s18 = smov [#allocation14]   ;;  %s2635_s0 = smov [#allocation7]  }
  0x6d   : > { %s674_s23 = sshll.u32 %s2634_s18, 4  ;;  %s606_s7 = sshll.u32 %s2635_s0, 4  ;;  %s675_s23 = int_to_ptr.vmem [resolvable:$true] %s674_s23  ;;  %s607_s7 = int_to_ptr.vmem [resolvable:$true] %s606_s7 }
  0x6e   : > { %s2375_s27 = scalar_lea.hbm %s3326_s17, 512 }
  0x6f   : > { %p2376_p7 = scmp.ne.s32.totalorder %s3326_s17, %s2375_s27  ;;  %p2382_p1 = scmp.lt.u32.totalorder %s2375_s27, %s3326_s17 }
  0x71   : > { %p2378_p9 = pnand %p2376_p7, %p2816_p8 }
  0x73   : > { %p2379_p4 = pneg %p2378_p9 }
  0x75   : > { %p2384_p3 = pnand %p2382_p1, %p2379_p4 }
  0x77   : > { %2387 = shalt.err (!%p2384_p3)
}
  0x78   : > { %s2388_s28 = scalar_lea.vmem %s675_s23, 512  ;;  %p2396_p13 = scmp.lt.s32.totalorder %s675_s23, %s675_s23 }
  0x79   : > { %p2389_p10 = scmp.ne.s32.totalorder %s675_s23, %s2388_s28  ;;  %p2397_p0 = scmp.lt.s32.totalorder %s2388_s28, %s2388_s28 }
  0x7b   : > { %p2391_p11 = pnand %p2389_p10, %p2816_p8  ;;  %p2398_p2 = por %p2397_p0, %p2396_p13 }
  0x7d   : > { %p2392_p12 = pneg %p2391_p11 }
  0x7f   : > { %p2399_p5 = pnand %p2398_p2, %p2392_p12 }
  0x81   : > { %2402 = shalt.err (!%p2399_p5)
}
  0x82   : > { %2193 = dma.hbm_to_vmem [thread:$0]  (!%p2802_p6), %s3326_s17, 512, %s675_s23, [#allocation15], %s2632_s21, %s2632_s21, %s2633_s16  }
  0x83   : > { %s2403_s20 = scalar_lea.hbm %s3317_s8, 16 }
  0x84   : > { %p2404_p7 = scmp.ne.s32.totalorder %s3317_s8, %s2403_s20  ;;  %p2410_p1 = scmp.lt.u32.totalorder %s2403_s20, %s3317_s8 }
  0x86   : > { %p2406_p9 = pnand %p2404_p7, %p2816_p8 }
  0x88   : > { %p2407_p4 = pneg %p2406_p9 }
  0x8a   : > { %p2412_p3 = pnand %p2410_p1, %p2407_p4 }
  0x8c   : > { %2415 = shalt.err (!%p2412_p3)
}
  0x8d   : > { %s2416_s1 = scalar_lea.vmem %s607_s7, 16  ;;  %s2423_s23 = scalar_lea.vmem %s607_s7, 32 }
  0x8e   : > { %p2417_p10 = scmp.ne.s32.totalorder %s607_s7, %s2416_s1  ;;  %p2424_p13 = scmp.lt.s32.totalorder %s607_s7, %s607_s7 }
  0x8f   : > { %p2425_p0 = scmp.lt.s32.totalorder %s2423_s23, %s2416_s1 }
  0x90   : > { %p2419_p11 = pnand %p2417_p10, %p2816_p8 }
  0x91   : > { %p2426_p2 = por %p2425_p0, %p2424_p13 }
  0x92   : > { %p2420_p12 = pneg %p2419_p11 }
  0x94   : > { %p2427_p5 = pnand %p2426_p2, %p2420_p12 }
  0x96   : > { %2430 = shalt.err (!%p2427_p5)
}
  0x97   : > { %2178 = dma.hbm_to_vmem [thread:$0]  (!%p2802_p6), %s3317_s8, 16, %s607_s7, [#allocation6]  }
  0x98   : > { %s2636_s9 = smov [#allocation10]   ;;  %s2637_s15 = smov [#allocation13]  }
  0x99   : > { %s631_s14 = sshll.u32 %s2636_s9, 4  ;;  %s655_s5 = sshll.u32 %s2637_s15, 4  ;;  %s632_s14 = int_to_ptr.vmem [resolvable:$true] %s631_s14  ;;  %s656_s5 = int_to_ptr.vmem [resolvable:$true] %s655_s5 }
  0x9a   : > { %s2431_s18 = scalar_lea.hbm %s3320_s11, 16 }
  0x9b   : > { %p2432_p7 = scmp.ne.s32.totalorder %s3320_s11, %s2431_s18  ;;  %p2438_p1 = scmp.lt.u32.totalorder %s2431_s18, %s3320_s11 }
  0x9d   : > { %p2434_p9 = pnand %p2432_p7, %p2816_p8 }
  0x9f   : > { %p2435_p4 = pneg %p2434_p9 }
  0xa1   : > { %p2440_p3 = pnand %p2438_p1, %p2435_p4 }
  0xa3   : > { %2443 = shalt.err (!%p2440_p3)
}
  0xa4   : > { %s2444_s7 = scalar_lea.vmem %s632_s14, 16  ;;  %s2451_s27 = scalar_lea.vmem %s632_s14, 32 }
  0xa5   : > { %p2445_p10 = scmp.ne.s32.totalorder %s632_s14, %s2444_s7  ;;  %p2452_p13 = scmp.lt.s32.totalorder %s632_s14, %s632_s14 }
  0xa6   : > { %p2453_p0 = scmp.lt.s32.totalorder %s2451_s27, %s2444_s7 }
  0xa7   : > { %p2447_p11 = pnand %p2445_p10, %p2816_p8 }
  0xa8   : > { %p2454_p2 = por %p2453_p0, %p2452_p13 }
  0xa9   : > { %p2448_p12 = pneg %p2447_p11 }
  0xab   : > { %p2455_p5 = pnand %p2454_p2, %p2448_p12 }
  0xad   : > { %2458 = shalt.err (!%p2455_p5)
}
  0xae   : > { %2184 = dma.hbm_to_vmem [thread:$0]  (!%p2802_p6), %s3320_s11, 16, %s632_s14, [#allocation9]  }
  0xaf   : > { %s2459_s22 = scalar_lea.hbm %s3322_s13, 16 }
  0xb0   : > { %p2460_p7 = scmp.ne.s32.totalorder %s3322_s13, %s2459_s22  ;;  %p2466_p1 = scmp.lt.u32.totalorder %s2459_s22, %s3322_s13 }
  0xb2   : > { %p2462_p9 = pnand %p2460_p7, %p2816_p8 }
  0xb4   : > { %p2463_p4 = pneg %p2462_p9 }
  0xb6   : > { %p2468_p3 = pnand %p2466_p1, %p2463_p4 }
  0xb8   : > { %2471 = shalt.err (!%p2468_p3)
}
  0xb9   : > { %s2472_s23 = scalar_lea.vmem %s656_s5, 16  ;;  %s2479_s14 = scalar_lea.vmem %s656_s5, 32 }
  0xba   : > { %p2473_p10 = scmp.ne.s32.totalorder %s656_s5, %s2472_s23  ;;  %p2480_p13 = scmp.lt.s32.totalorder %s656_s5, %s656_s5 }
  0xbb   : > { %p2481_p0 = scmp.lt.s32.totalorder %s2479_s14, %s2472_s23 }
  0xbc   : > { %p2475_p11 = pnand %p2473_p10, %p2816_p8 }
  0xbd   : > { %p2482_p2 = por %p2481_p0, %p2480_p13 }
  0xbe   : > { %p2476_p12 = pneg %p2475_p11 }
  0xc0   : > { %p2483_p5 = pnand %p2482_p2, %p2476_p12 }
  0xc2   : > { %2486 = shalt.err (!%p2483_p5)
}
  0xc3   : > { %2190 = dma.hbm_to_vmem [thread:$0]  (!%p2802_p6), %s3322_s13, 16, %s656_s5, [#allocation12]  }
  0xc4   : > { %s2638_s28 = smov [#allocation16]   ;;  %s2487_s22 = scalar_lea.hbm %s3328_s19, 512 }
  0xc5   : > { %s690_s9 = sshll.u32 %s2638_s28, 4  ;;  %p2488_p7 = scmp.ne.s32.totalorder %s3328_s19, %s2487_s22  ;;  %s691_s9 = int_to_ptr.vmem [resolvable:$true] %s690_s9 }
  0xc6   : > { %p2494_p1 = scmp.lt.u32.totalorder %s2487_s22, %s3328_s19 }
  0xc7   : > { %p2490_p9 = pnand %p2488_p7, %p2816_p8 }
  0xc9   : > { %p2491_p4 = pneg %p2490_p9 }
  0xcb   : > { %p2496_p3 = pnand %p2494_p1, %p2491_p4 }
  0xcd   : > { %2499 = shalt.err (!%p2496_p3)
}
  0xce   : > { %s2500_s5 = scalar_lea.vmem %s691_s9, 512  ;;  %p2508_p13 = scmp.lt.s32.totalorder %s691_s9, %s691_s9 }
  0xcf   : > { %p2501_p10 = scmp.ne.s32.totalorder %s691_s9, %s2500_s5  ;;  %p2509_p0 = scmp.lt.s32.totalorder %s2500_s5, %s2500_s5 }
  0xd1   : > { %p2503_p11 = pnand %p2501_p10, %p2816_p8  ;;  %p2510_p2 = por %p2509_p0, %p2508_p13 }
  0xd3   : > { %p2504_p12 = pneg %p2503_p11 }
  0xd5   : > { %p2511_p5 = pnand %p2510_p2, %p2504_p12 }
  0xd7   : > { %2514 = shalt.err (!%p2511_p5)
}
  0xd8   : > { %2196 = dma.hbm_to_vmem [thread:$0]  (!%p2802_p6), %s3328_s19, 512, %s691_s9, [#allocation15], %s2632_s21, %s2632_s21, %s2633_s16  }
  0xd9   : > { %s1893_s29 = sadd.s32 4294967294, %s2627_s25   ;;  %s2980_s6 = sadd.s32 1, %s2627_s25  }
  0xda   : > { %s47_s7 = ssub.s32 %s2627_s25, %s2980_s6  ;;  %s50_s27 = sadd.s32 1, %s2623_s24 }
  0xdb   : > { %p48_p8 = scmp.eq.s32.totalorder %s47_s7, 0  ;;  %p57_p7 = scmp.ne.s32.totalorder %s2623_s24, %s2619_s30 }
  0xdc   : > { %p58_p9 = scmp.eq.s32.totalorder %s2627_s25, 0  ;;  %p63_p4 = scmp.ne.s32.totalorder %s2619_s30, %s2615_s4 }
  0xdd   : > { %s2991_s28 = scalar_select %p48_p8, %s2623_s24, %s50_s27  }
  0xde   : > { %p2993_p1 = por %p58_p9, %p57_p7  ;;  %p3370_p3 = scmp.eq.s32.totalorder %s2786_s26, 0 }
  0xdf   : > { %p554_p10 = scmp.eq.s32.totalorder %s2786_s26, 1  ;;  %p560_p11 = scmp.eq.s32.totalorder %s1893_s29, 1 }
  0xe0   : > { %p2999_p6 = por %p3370_p3, %p63_p4  ;;  %p2213_p12 = scmp.lt.s32.totalorder %s2627_s25, 2 }
  0xe1   : > { %s713_s16 = sand.u32 1, %s2623_s24   ;;  %p3006_p13 = por %p554_p10, %p57_p7 }
  0xe2   : > { %p3010_p0 = por %p560_p11, %p63_p4  ;;  %s1904_s22 = sshll.u32 %s713_s16, 3 }
  0xe3   : > { %s3372_s9 = scalar_select %p3006_p13, 1, 0 }
  0xe4   : > { %s3373_s20 = scalar_select %p3010_p0, 1, 0 }
  0xe5   : > { %s1905_s18 = sshll.u32 %s2627_s25, 7  ;;  %s3374_s1 = sld [smem:[#allocation24_spill]] }
  0xe6   : > { %s717_s23 = scalar_lea.vmem [#allocation2], %s1904_s22  ;;  %p3024_p2 = pnand %p2213_p12, %p2993_p1 }
  0xe7   : > { %s724_s14 = sshll.u32 %s717_s23, 4  ;;  %s714_s7 = scalar_lea.sflag [#allocation3], %s713_s16  ;;  %s3020_s14 = int_to_ptr.vmem [resolvable:$true] %s724_s14 }
  0xe8   : > { %p2517_p8 = pneg %p3024_p2 }
  0xeb   : > { %s3018_s5 = scalar_lea.hbm %s3374_s1, %s1905_s18  ;;  %s2520_s0 = scalar_lea.hbm %s3374_s1, 256 }
  0xec   : > { %s2515_s27 = scalar_lea.hbm %s3018_s5, 128  ;;  %p2521_p4 = scmp.lt.u32.totalorder %s3018_s5, %s3374_s1 }
  0xed   : > { %p2516_p5 = scmp.ne.s32.totalorder %s3018_s5, %s2515_s27  ;;  %p2522_p1 = scmp.lt.u32.totalorder %s2520_s0, %s2515_s27 }
  0xee   : > { %p2524_p10 = scmp.lt.u32.totalorder %s2515_s27, %s3018_s5 }
  0xef   : > { %p2518_p7 = pnand %p2517_p8, %p2516_p5  ;;  %p2523_p3 = por %p2522_p1, %p2521_p4 }
  0xf1   : > { %p2519_p9 = pneg %p2518_p7  ;;  %p2525_p11 = por %p2524_p10, %p2523_p3 }
  0xf3   : > { %p2526_p12 = pnand %p2525_p11, %p2519_p9 }
  0xf5   : > { %2529 = shalt.err (!%p2526_p12)
}
  0xf6   : > { %s2530_s16 = scalar_lea.vmem %s3020_s14, 128  ;;  %s2639_s23 = smov [#allocation2]  }
  0xf7   : > { %p2531_p5 = scmp.ne.s32.totalorder %s3020_s14, %s2530_s16  ;;  %s2535_s22 = sshll.u32 %s2639_s23, 4  ;;  %s2536_s22 = int_to_ptr.vmem [resolvable:$false] %s2535_s22 }
  0xf8   : > { %s2537_s18 = scalar_lea.vmem %s2536_s22, 256  ;;  %p2538_p13 = scmp.lt.s32.totalorder %s3020_s14, %s2536_s22 }
  0xf9   : > { %p2533_p7 = pnand %p2531_p5, %p2517_p8  ;;  %p2539_p4 = scmp.lt.s32.totalorder %s2537_s18, %s2530_s16 }
  0xfb   : > { %p2534_p0 = pneg %p2533_p7  ;;  %p2540_p1 = por %p2539_p4, %p2538_p13 }
  0xfd   : > { %p2541_p3 = pnand %p2540_p1, %p2534_p0 }
  0xff   : > { %2544 = shalt.err (!%p2541_p3)
}
 0x100   : > { %2200 = dma.hbm_to_vmem [thread:$0]  (!%p3024_p2), %s3018_s5, 128, %s3020_s14, %s714_s7  }
 0x101   : > { %p3376_p9 = scmp.ne.s32.totalorder %s3364_s2, 0 }
 0x102   : > { %s3056_s27 = sand.u32 (!%p3376_p9), 1, %s2619_s30  }
 0x103   : > { %740 = sbr.rel (%p3376_p9) target bundleno = 1830 (0x726), region = 112  ;;  %s3344_s0 = sshll.u32 (!%p3376_p9), %s3056_s27, 3 }
 0x104   : > { %s743_s15 = scalar_lea.sflag (!%p3376_p9), [#allocation3], %s3056_s27  ;;  %s746_s3 = scalar_lea.vmem (!%p3376_p9), [#allocation2], %s3344_s0 }
 0x10a   : > { %2590 = dma.done.wait (%p2999_p6), %s743_s15, 128  }
 0x10b   : > { %2592 = vsyncadd (%p2999_p6), %s743_s15, 4294967168  ;;  %p3377_p13 = scmp.eq.s32.totalorder %s2786_s26, 0 }
 0x10d   : > { %2594 = dma.done.wait (%p3377_p13), [#allocation6], 80   ;;  %p3378_p0 = pmov %p3377_p13 }
 0x10f   : > { %2596 = vsyncadd (%p3378_p0), [#allocation6], 4294967216  ;;  %p3379_p2 = pmov %p3378_p0 }
 0x110   : > { %p3380_p8 = pmov %p3378_p0 }
 0x111   : > { %2598 = dma.done.wait (%p3379_p2), [#allocation9], 32  }
 0x112   : > { %2600 = vsyncadd (%p3380_p8), [#allocation9], 4294967264  ;;  %p3381_p10 = pmov %p3378_p0 }
 0x113   : > { %p3382_p11 = pmov %p3378_p0 }
 0x114   : > { %2602 = dma.done.wait (%p3381_p10), [#allocation12], 528  }
 0x115   : > { %2604 = vsyncadd (%p3382_p11), [#allocation12], 4294966768  ;;  %p3383_p6 = pmov %p3378_p0 }
 0x116   : > { %p3384_p12 = pmov %p3378_p0 }
 0x117   : > { %2606 = dma.done.wait (%p3383_p6), [#allocation15], 1024  }
 0x118   : > { %2608 = vsyncadd (%p3384_p12), [#allocation15], 4294966272  ;;  %v3082_v0 = vld [vmem:[%s746_s3] sm:$0xff]  ;;  %vm854_vm0 = vcmask 261120   ;;  %s3385_s5 = sld [smem:[#allocation27_spill]]  ;;  %s3386_s23 = sld [smem:[#allocation29_spill]]  ;;  %v865_v28 = vlaneseq }
 0x119   : > { %v853_v1 = vmul.f32 %v3082_v0, %v3082_v0  ;;  %v2640_v6 = vmov 0.0|0.0   ;;  %vm2641_vm1 = vmmov 0   ;;  %v2642_v14 = vmov 0.0   ;;  %p845_p5 = scmp.lt.s32.totalorder %s2786_s26, 1  ;;  %s3387_s2 = sld [smem:[#allocation25_spill]]  ;;  %v1116_v38 = vld [vmem:[%s3319_s10] sm:$0xff] }
 0x11a   : > { %2082 = vmatprep.subr.bf16.mxu0 %v2640_v6  ;;  %2088 = vmatprep.subr.bf16.mxu1 %v2640_v6  ;;  %v2643_v17 = vmov 0   ;;  %vm1054_vm2 = vcmask 1040384   ;;  %v866_v30 = vshrl.u32 %v865_v28, 7  ;;  %s3388_s7 = sld [smem:[#allocation26_spill]]  ;;  %v1117_v39 = vld [vmem:[%s3319_s10 + $0x8] sm:$0xff]  ;;  %v1206_v40 = vld [vmem:[#allocation11] sm:$0xff] }
 0x11b   : > { %v855_v2 = vsel %vm854_vm0, %v853_v1, 0.0  ;;  %1994 = vmatprep.mubr.msk.f32.mxu0 %vm2641_vm1, %v2642_v14  ;;  %2005 = vmatprep.mubr.msk.f32.mxu1 %vm2641_vm1, %v2642_v14  ;;  %s846_s22 = scalar_select %p845_p5, %s2786_s26, 1  ;;  %v2095_v41 = vpack.c.bf16 %v1117_v39, %v1116_v38  ;;  %v1207_v42 = vld [vmem:[#allocation11 + $0x8] sm:$0xff]  ;;  %v1118_v44 = vld [vmem:[%s3319_s10 + $0x10] sm:$0xff]  ;;  %v1119_v45 = vld [vmem:[%s3319_s10 + $0x18] sm:$0xff]  ;;  %vm1336_vm5 = vcmask 1041408  }
 0x11c   : > { %856 = vadd.xlane.f32.xlu0 %v855_v2  ;;  %2270 = vset.pattern.permute.xlu1 %v2643_v17  ;;  %v3131_v33 = vsub.s32 0, %v866_v30  ;;  %v2101_v43 = vpack.c.bf16 %v1207_v42, %v1206_v40  ;;  %v2098_v46 = vpack.c.bf16 %v1119_v45, %v1118_v44  ;;  %v1208_v47 = vld [vmem:[#allocation11 + $0x10] sm:$0xff]  ;;  %v1209_v48 = vld [vmem:[#allocation11 + $0x18] sm:$0xff]  ;;  %s3389_s16 = sld [smem:[#allocation30_spill]]  ;;  %v1048_v53 = vsub.s32 3, %v866_v30  ;;  %s3390_s15 = sld [smem:[#allocation33_spill]] }
 0x11d   : > { %2269 = vset.pattern.permute.xlu0 %v2643_v17  ;;  %s1917_s18 = sshll.u32 %s846_s22, 3  ;;  %v2104_v49 = vpack.c.bf16 %v1209_v48, %v1208_v47  ;;  %v1064_v54 = vsub.s32 2, %v866_v30  ;;  %v1045_v56 = vld [vmem:[#allocation5] sm:$0xf]  ;;  %v1084_v60 = vsub.s32 1, %v866_v30  ;;  %vm1348_vm6 = vcmask 1043456  }
 0x11e   : > { %v871_v3 = vld [vmem:[%s3385_s5] sm:$0xff]  ;;  %v872_v4 = vld [vmem:[%s3385_s5 + $0x8] sm:$0xff]  ;;  %v873_v9 = vld [vmem:[%s3385_s5 + $0x10] sm:$0xff]  ;;  %v1049_v62 = vrot.slane %v1045_v56, %v1048_v53  ;;  %s3395_s0 = sld [smem:[#allocation36_spill]]  ;;  %vm1645_vm7 = vcmask 523264   ;;  %s3397_s29 = sld [smem:[#allocation39_spill]] }
 0x11f   : > { %v964_v5 = vld [vmem:[%s3386_s23] sm:$0xff]  ;;  %v2083_v7 = vpack.c.bf16 %v872_v4, %v871_v3  ;;  %v965_v8 = vld [vmem:[%s3386_s23 + $0x8] sm:$0xff]  ;;  %v874_v10 = vld [vmem:[%s3385_s5 + $0x18] sm:$0xff]  ;;  %s848_s21 = scalar_lea.vmem %s3387_s2, %s1917_s18  ;;  %v1065_v63 = vrot.slane %v1045_v56, %v1064_v54  ;;  %s3391_s18 = sld [smem:[#allocation28_spill]] }
 0x120   : > { %v2089_v11 = vpack.c.bf16 %v965_v8, %v964_v5  ;;  %v966_v12 = vld [vmem:[%s3386_s23 + $0x10] sm:$0xff]  ;;  %v967_v13 = vld [vmem:[%s3386_s23 + $0x18] sm:$0xff]  ;;  %v2086_v15 = vpack.c.bf16 %v874_v10, %v873_v9  ;;  %v850_v18 = vld [vmem:[%s848_s21] sm:$0xff]  ;;  %v1085_v5 = vrot.slane %v1045_v56, %v1084_v60  ;;  %s3392_s21 = sld [smem:[#allocation34_spill]]  ;;  %p3400_p4 = scmp.ne.s32.totalorder %s3372_s9, 0 }
 0x121   : > { %2084 = vmatpush3.bf16.msra.mxu0 %v2083_v7  ;;  %v2092_v16 = vpack.c.bf16 %v967_v13, %v966_v12  ;;  %v851_v19 = vsub.f32 1.0, %v850_v18  ;;  %v852_v31 = vld [vmem:[%s3388_s7] sm:$0x1]  ;;  %v1105_v12 = vrot.slane %v1045_v56, %v3131_v33  ;;  %v1926_v30 = vld [vmem:[#allocation13] ss:$0 sm:$0xff]  ;;  %s3393_s7 = sld [smem:[#allocation35_spill]] }
 0x122   : > { %2090 = vmatpush3.bf16.msra.mxu1 %v2089_v11  ;;  %2085 = vmatprep.subr.bf16.mxu0 %v2640_v6  ;;  %v863_v32 = vadd.f32 1.0, %v852_v31  ;;  %v1920_v50 = vld [vmem:[%s3389_s16] ss:$0 sm:$0xff]  ;;  %v1356_v28 = vld [vmem:[%s3390_s15 + $0x18] sm:$0xff]  ;;  %s3398_s16 = sshll.u32 %s3056_s27, 3  ;;  %s2644_s14 = smov [#allocation17]  }
 0x123   : > { %2091 = vmatprep.subr.bf16.mxu1 %v2640_v6  ;;  %v1072_v20 = vrot.slane %v851_v19, 7  ;;  %v1923_v40 = vld [vmem:[#allocation10] ss:$0 sm:$0xff]  ;;  %s844_s22 = scalar_lea.vmem [#allocation17], %s3398_s16 }
 0x124   : > { %v868_v34 = vrot.slane %v863_v32, %v3131_v33  ;;  %s1735_s1 = sshll.u32 %s844_s22, 4  ;;  %s3266_s1 = int_to_ptr.vmem [resolvable:$true] %s1735_s1 }
 0x125   : > { %2087 = vmatpush3.bf16.msra.mxu0 %v2086_v15  ;;  %v1074_v21 = vsel %vm1054_vm2, 1.0, %v1072_v20  ;;  %v1918_v48 = vld [vmem:[%s3391_s18] ss:$0 sm:$0xff]  ;;  %s3394_s18 = sld [smem:[#allocation38_spill]] }
 0x126   : > { %2093 = vmatpush3.bf16.msra.mxu1 %v2092_v16  ;;  %2094 = vmatprep.subr.bf16.mxu0 %v2640_v6  ;;  %v1075_v22 = vmul.f32 %v1074_v21, %v851_v19  ;;  %v1922_v21 = vld [vmem:[#allocation7] ss:$0 sm:$0xff] }
 0x127   : > { %2100 = vmatprep.subr.bf16.mxu1 %v2640_v6 }
 0x128   : > { %1078 = vperm.xlu1 %2270, %v1075_v22   ;;  %v1092_v23 = vrot.slane %v1075_v22, 7 }
 0x12a   : > { %v1094_v24 = vsel %vm1054_vm2, 1.0, %v1092_v23 }
 0x12b   : > { %v1095_v25 = vmul.f32 %v1094_v24, %v851_v19  ;;  %v1353_v24 = vld [vmem:[%s3390_s15] sm:$0xff] }
 0x12d   : > { %1098 = vperm.xlu1 %2270, %v1095_v25   ;;  %v1354_v25 = vld [vmem:[%s3390_s15 + $0x8] sm:$0xff] }
 0x131   : > { %1315 = vperm.xlu1 %2270, %v850_v18  }
 0x132   : > { %1058 = vperm.xlu0 %2269, %v851_v19  }
 0x1a7   : > { %v1079_v1 = vpop.permute.xlu1 %1078 }
 0x1a9   : > { %v857_v26 = vpop.xlane.xlu0 %856 }
 0x1aa   : > { %v859_v27 = vmul.f32 0.03125, %v857_v26  ;;  %v1355_v26 = vld [vmem:[%s3390_s15 + $0x10] sm:$0xff] }
 0x1ac   : > { %v860_v29 = vadd.f32 1e-06, %v859_v27  ;;  %v1099_v15 = vpop.permute.xlu1 %1098  ;;  %v2107_v27 = vpack.c.bf16 %v1354_v25, %v1353_v24 }
 0x1ae   : > { %2271 = vrsqrt.f32 %v860_v29  ;;  %v2110_v29 = vpack.c.bf16 %v1356_v28, %v1355_v26 }
 0x1b1   : > { %v3162_v61 = vpop.permute.xlu0 %1058 }
 0x1b8   : > { %v2272_v35 = vpop.eup %2271 }
 0x1b9   : > { %v862_v36 = vmul.f32 %v2272_v35, %v3082_v0 }
 0x1bb   : > { %v870_v37 = vmul.f32 %v868_v34, %v862_v36 }
 0x1bd   : > { %1995 = vmatmul.mubr.msk.f32.vlgmr.msra.gmra.mrb[0].mxu0 %vm854_vm0, %v870_v37  ;;  %2006 = vmatmul.mubr.msk.f32.vlgmr.msra.gmra.mrb[0].mxu1 %vm854_vm0, %v870_v37 }
 0x1be   : > { %2016 = vmatprep.mubr.msk.f32.mxu0 %vm2641_vm1, %v2642_v14  ;;  %2027 = vmatprep.mubr.msk.f32.mxu1 %vm2641_vm1, %v2642_v14 }
 0x1bf   : > { %2096 = vmatpush3.bf16.msra.mxu0 %v2095_v41  ;;  %2102 = vmatpush3.bf16.msra.mxu1 %v2101_v43  ;;  %v1929_v41 = vld [vmem:[#allocation8] ss:$0 sm:$0xff] }
 0x1c0   : > { %2097 = vmatprep.subr.bf16.mxu0 %v2640_v6  ;;  %2103 = vmatprep.subr.bf16.mxu1 %v2640_v6 }
 0x1c3   : > { %2099 = vmatpush3.bf16.msra.mxu0 %v2098_v46  ;;  %2105 = vmatpush3.bf16.msra.mxu1 %v2104_v49 }
 0x1c4   : > { %2106 = vmatprep.subr.bf16.mxu0 %v2640_v6  ;;  %2112 = vmatprep.subr.bf16.mxu1 %v2640_v6 }
 0x290   : > { %v3160_v51 = vpop.f32.mrb[0].mxu0  ;;  %v1041_v52 = vpop.f32.mrb[0].mxu1 }
 0x291   : > { %v1042_v55 = vadd.f32 %v1920_v50, %v1041_v52  ;;  %v1996_v57 = vpop.f32.mrb[1].mxu0  ;;  %v2007_v58 = vpop.f32.mrb[1].mxu1  ;;  %v952_v53 = vadd.f32 %v1918_v48, %v3160_v51  ;;  %v1458_v48 = vld [vmem:[#allocation14 + $0x18] sm:$0xff] }
 0x292   : > { %v1316_v51 = vpop.permute.xlu1 %1315 }
 0x293   : > { %v1052_v59 = vrot.slane %v1042_v55, 7  ;;  %v1050_v7 = vmul.f32 %v1049_v62, %v1042_v55  ;;  %v956_v55 = vmul.f32 0.044715, %v952_v53  ;;  %v955_v28 = vmul.f32 0.5, %v952_v53 }
 0x295   : > { %v1055_v2 = vsel %vm1054_vm2, 0.0, %v1052_v59  ;;  %v957_v56 = vmul.f32 %v956_v55, %v952_v53 }
 0x296   : > { %v1069_v3 = vrot.slane %v1055_v2, 7  ;;  %v1061_v4 = vmul.f32 %v3162_v61, %v1055_v2 }
 0x297   : > { %v958_v58 = vmul.f32 %v957_v56, %v952_v53  ;;  %v1438_v56 = vld [vmem:[%s3393_s7] sm:$0x1]  ;;  %s1939_s7 = sshll.u32 %s2786_s26, 7  ;;  %s1722_s26 = scalar_lea.sflag [#allocation4], %s3056_s27 }
 0x298   : > { %v1071_v8 = vsel %vm1054_vm2, 0.0, %v1069_v3  ;;  %v1066_v9 = vmul.f32 %v1065_v63, %v1061_v4 }
 0x299   : > { %v1081_v10 = vmul.f32 %v1079_v1, %v1071_v8  ;;  %v1089_v11 = vrot.slane %v1071_v8, 7  ;;  %v959_v3 = vadd.f32 %v958_v58, %v952_v53 }
 0x29a   : > { %v1067_v13 = vadd.f32 %v1066_v9, %v1050_v7 }
 0x29b   : > { %v1086_v16 = vmul.f32 %v1085_v5, %v1081_v10  ;;  %v1091_v17 = vsel %vm1054_vm2, 0.0, %v1089_v11  ;;  %v960_v9 = vmul.f32 0.7978846, %v959_v3 }
 0x29c   : > { %v1101_v18 = vmul.f32 %v1099_v15, %v1091_v17 }
 0x29d   : > { %v1087_v19 = vadd.f32 %v1086_v16, %v1067_v13 }
 0x29e   : > { %v1106_v20 = vmul.f32 %v1105_v12, %v1101_v18 }
 0x2a0   : > { %v1107_v22 = vadd.f32 %v1106_v20, %v1087_v19 }
 0x2a2   : > { %v1115_v23 = vadd.f32 %v1922_v21, %v1107_v22 }
 0x2a4   : > { %2017 = vmatmul.mubr.msk.f32.vlgmr.msra.gmra.mrb[2].mxu0 %vm854_vm0, %v1115_v23  ;;  %2028 = vmatmul.mubr.msk.f32.vlgmr.msra.gmra.mrb[2].mxu1 %vm854_vm0, %v1115_v23 }
 0x2a5   : > { %2038 = vmatprep.mubr.msk.f32.mxu0 %vm2641_vm1, %v2642_v14  ;;  %2049 = vmatprep.mubr.msk.f32.mxu1 %vm2641_vm1, %v2642_v14 }
 0x2a6   : > { %2108 = vmatpush3.bf16.msra.mxu0 %v2107_v27 }
 0x2a7   : > { %2109 = vmatprep.subr.bf16.mxu0 %v2640_v6 }
 0x2aa   : > { %2111 = vmatpush3.bf16.msra.mxu0 %v2110_v29 }
 0x2ab   : > { %2118 = vmatprep.subr.bf16.mxu0 %v2640_v6 }
 0x377   : > { %v1196_v31 = vpop.f32.mrb[2].mxu0  ;;  %v1283_v32 = vpop.f32.mrb[2].mxu1 }
 0x378   : > { %v1284_v34 = vadd.f32 %v1926_v30, %v1283_v32  ;;  %v2018_v35 = vpop.f32.mrb[3].mxu0  ;;  %v2029_v36 = vpop.f32.mrb[3].mxu1  ;;  %v1197_v42 = vadd.f32 %v1923_v40, %v1196_v31 }
 0x37a   : > { %v1928_v37 = vmul.f32 -1.442695, %v1284_v34  ;;  %v1925_v45 = vmul.f32 -1.442695, %v1197_v42  ;;  %v1930_v34 = vld [vmem:[%s3392_s21] ss:$0 sm:$0xff] }
 0x37b   : > { %v1456_v42 = vld [vmem:[#allocation14 + $0x8] sm:$0xff]  ;;  %s3396_s21 = sld [smem:[#allocation37_spill]] }
 0x37c   : > { %2273 = vpow2.f32 %v1928_v37 }
 0x386   : > { %v2274_v38 = vpop.eup %2273 }
 0x387   : > { %v1290_v39 = vadd.f32 1.0, %v2274_v38 }
 0x389   : > { %2275 = vrcp.f32 %v1290_v39 }
 0x393   : > { %v2276_v43 = vpop.eup %2275 }
 0x394   : > { %v1300_v44 = vmul.f32 %v2276_v43, %v1929_v41  ;;  %v1455_v41 = vld [vmem:[#allocation14] sm:$0xff] }
 0x395   : > { %v1460_v43 = vld [vmem:[#allocation16] sm:$0xff] }
 0x396   : > { %v1301_v46 = vmul.f32 1.442695, %v1300_v44  ;;  %v2113_v44 = vpack.c.bf16 %v1456_v42, %v1455_v41 }
 0x398   : > { %2277 = vpow2.f32 %v1301_v46  ;;  %2114 = vmatpush3.bf16.msra.mxu1 %v2113_v44 }
 0x399   : > { %2279 = vpow2.f32 %v1925_v45  ;;  %v1461_v45 = vld [vmem:[#allocation16 + $0x8] sm:$0xff]  ;;  %2115 = vmatprep.subr.bf16.mxu1 %v2640_v6 }
 0x39a   : > { %v2119_v46 = vpack.c.bf16 %v1461_v45, %v1460_v43 }
 0x3a2   : > { %v2278_v47 = vpop.eup %2277 }
 0x3a3   : > { %v1303_v49 = vmul.f32 %v2278_v47, %v2278_v47  ;;  %v2280_v50 = vpop.eup %2279  ;;  %v1321_v2 = vmul.f32 %v2278_v47, %v3162_v61  ;;  %v1457_v47 = vld [vmem:[#allocation14 + $0x10] sm:$0xff] }
 0x3a4   : > { %v1203_v54 = vadd.f32 1.0, %v2280_v50  ;;  %v1463_v50 = vld [vmem:[#allocation16 + $0x18] sm:$0xff] }
 0x3a5   : > { %v1304_v52 = vsub.f32 1.0, %v1303_v49  ;;  %v1323_v8 = vrot.slane %v1321_v2, 7  ;;  %v2116_v49 = vpack.c.bf16 %v1458_v48, %v1457_v47 }
 0x3a7   : > { %2281 = vrsqrt.f32 %v1304_v52  ;;  %vm1307_vm3 = vcmp.eq.f32.partialorder %v1304_v52, inf  ;;  %v1310_v60 = vand.u32 2147483648, %v1304_v52  ;;  %vm1309_vm4 = vcmp.eq.f32.partialorder %v1304_v52, 0.0  ;;  %2117 = vmatpush3.bf16.msra.mxu1 %v2116_v49 }
 0x3a8   : > { %2283 = vrcp.f32 %v1203_v54  ;;  %v1325_v12 = vsel %vm1054_vm2, 1.0, %v1323_v8  ;;  %2124 = vmatprep.subr.bf16.mxu1 %v2640_v6  ;;  %v1472_v8 = vld [vmem:[%s3394_s18 + $0x38] sm:$0xff] }
 0x3a9   : > { %2285 = vtanh.f32 %v960_v9  ;;  %v1332_v16 = vmul.f32 %v1325_v12, %v1321_v2 }
 0x3ab   : > { %v1334_v19 = vrot.slane %v1332_v16, 6 }
 0x3ad   : > { %v1337_v22 = vsel %vm1336_vm5, 1.0, %v1334_v19 }
 0x3ae   : > { %v1344_v26 = vmul.f32 %v1337_v22, %v1332_v16 }
 0x3b1   : > { %v2282_v57 = vpop.eup %2281 }
 0x3b2   : > { %v1306_v59 = vmul.f32 %v2282_v57, %v1304_v52  ;;  %v2284_v63 = vpop.eup %2283  ;;  %v1447_v57 = vadd.f32 1.0, %v1438_v56 }
 0x3b3   : > { %v1319_v5 = vmul.f32 %v2284_v63, %v1115_v23  ;;  %v2286_v21 = vpop.eup %2285  ;;  %v1465_v63 = vld [vmem:[%s3394_s18] sm:$0xff] }
 0x3b4   : > { %v1308_v62 = vsel %vm1307_vm3, %v1304_v52, %v1306_v59  ;;  %v962_v25 = vadd.f32 1.0, %v2286_v21  ;;  %v1452_v58 = vrot.slane %v1447_v57, %v3131_v33  ;;  %v1934_v21 = vld [vmem:[%s3396_s21] ss:$0 sm:$0xff]  ;;  %s3399_s21 = sld [smem:[#allocation40_spill]] }
 0x3b5   : > { %v1311_v1 = vsel %vm1309_vm4, %v1310_v60, %v1308_v62 }
 0x3b6   : > { %v1312_v4 = vmul.f32 %v1311_v1, %v3162_v61  ;;  %v963_v30 = vmul.f32 %v962_v25, %v955_v28  ;;  %v1466_v1 = vld [vmem:[%s3394_s18 + $0x8] sm:$0xff] }
 0x3b7   : > { %v2125_v33 = vpack.c.bf16 %v1466_v1, %v1465_v63 }
 0x3b8   : > { %v1318_v7 = vadd.f32 %v1316_v51, %v1312_v4  ;;  %v1469_v4 = vld [vmem:[%s3394_s18 + $0x20] sm:$0xff]  ;;  %v1470_v51 = vld [vmem:[%s3394_s18 + $0x28] sm:$0xff] }
 0x3ba   : > { %v1320_v10 = vmul.f32 %v1319_v5, %v1318_v7  ;;  %v2131_v5 = vpack.c.bf16 %v1470_v51, %v1469_v4  ;;  %v1471_v7 = vld [vmem:[%s3394_s18 + $0x30] sm:$0xff]  ;;  %s3264_s5 = scalar_lea.hbm %s3399_s21, %s1939_s7 }
 0x3bb   : > { %v2134_v9 = vpack.c.bf16 %v1472_v8, %v1471_v7 }
 0x3bc   : > { %v1327_v11 = vrot.slane %v1320_v10, 7 }
 0x3be   : > { %v1329_v13 = vsel %vm1054_vm2, 0.0, %v1327_v11 }
 0x3bf   : > { %v1330_v15 = vmul.f32 %v1329_v13, %v1321_v2  ;;  %v1467_v2 = vld [vmem:[%s3394_s18 + $0x10] sm:$0xff] }
 0x3c1   : > { %v1331_v17 = vadd.f32 %v1330_v15, %v1320_v10  ;;  %v1932_v10 = vld [vmem:[%s3395_s0] ss:$0 sm:$0xff]  ;;  %s2545_s0 = scalar_lea.vmem %s3266_s1, 128 }
 0x3c2   : > { %p2546_p7 = scmp.ne.s32.totalorder %s3266_s1, %s2545_s0 }
 0x3c3   : > { %v1339_v18 = vrot.slane %v1331_v17, 6 }
 0x3c4   : > { %p2547_p1 = pnand %p2546_p7, %p3400_p4 }
 0x3c5   : > { %v1341_v20 = vsel %vm1336_vm5, 0.0, %v1339_v18 }
 0x3c6   : > { %v1342_v61 = vmul.f32 %v1341_v20, %v1332_v16  ;;  %p2548_p3 = pneg %p2547_p1 }
 0x3c8   : > { %v1343_v23 = vadd.f32 %v1342_v61, %v1331_v17 }
 0x3ca   : > { %v1346_v24 = vrot.slane %v1343_v23, 4 }
 0x3cc   : > { %v1349_v27 = vsel %vm1348_vm6, 0.0, %v1346_v24 }
 0x3cd   : > { %v1350_v29 = vmul.f32 %v1349_v27, %v1344_v26  ;;  %v1936_v27 = vld [vmem:[%s3397_s29] ss:$0 sm:$0xff]  ;;  %s2549_s29 = sshll.u32 %s2644_s14, 4  ;;  %s2550_s29 = int_to_ptr.vmem [resolvable:$false] %s2549_s29 }
 0x3ce   : > { %s2551_s16 = scalar_lea.vmem %s2550_s29, 256  ;;  %p2552_p9 = scmp.lt.s32.totalorder %s3266_s1, %s2550_s29 }
 0x3cf   : > { %v1351_v31 = vadd.f32 %v1350_v29, %v1343_v23  ;;  %p2553_p13 = scmp.lt.s32.totalorder %s2551_s16, %s2545_s0 }
 0x3d1   : > { %v1352_v32 = vmul.f32 %v1351_v31, %v963_v30  ;;  %p2554_p0 = por %p2553_p13, %p2552_p9 }
 0x3d3   : > { %2039 = vmatmul.mubr.msk.f32.vlgmr.msra.gmra.mrb[4].mxu0 %vm854_vm0, %v1352_v32  ;;  %p2555_p2 = pnand %p2554_p0, %p2548_p3 }
 0x3d4   : > { %2060 = vmatprep.mubr.msk.f32.mxu0 %vm2641_vm1, %v2642_v14  ;;  %2120 = vmatpush3.bf16.msra.mxu0 %v2119_v46 }
 0x3d5   : > { %2121 = vmatprep.subr.bf16.mxu0 %v2640_v6 }
 0x4a6   : > { %v1433_v35 = vpop.f32.mrb[4].mxu0 }
 0x4a7   : > { %v1434_v36 = vadd.f32 %v1930_v34, %v1433_v35  ;;  %v2040_v37 = vpop.f32.mrb[5].mxu0 }
 0x4a9   : > { %v3204_v38 = vadd.f32 %v1434_v36, %v3082_v0  ;;  %v1462_v0 = vld [vmem:[#allocation16 + $0x10] sm:$0xff] }
 0x4aa   : > { %v2122_v52 = vpack.c.bf16 %v1463_v50, %v1462_v0 }
 0x4ab   : > { %v1439_v39 = vmul.f32 %v3204_v38, %v3204_v38 }
 0x4ac   : > { %2123 = vmatpush3.bf16.msra.mxu0 %v2122_v52 }
 0x4ad   : > { %v1440_v40 = vsel %vm854_vm0, %v1439_v39, 0.0 }
 0x4ae   : > { %1441 = vadd.xlane.f32.xlu1 %v1440_v40 }
 0x53b   : > { %v1442_v53 = vpop.xlane.xlu1 %1441 }
 0x53c   : > { %v1443_v54 = vmul.f32 0.03125, %v1442_v53 }
 0x53e   : > { %v1444_v55 = vadd.f32 1e-06, %v1443_v54 }
 0x540   : > { %2287 = vrsqrt.f32 %v1444_v55 }
 0x54a   : > { %v2288_v59 = vpop.eup %2287 }
 0x54b   : > { %v1446_v60 = vmul.f32 %v2288_v59, %v3204_v38 }
 0x54d   : > { %v1454_v62 = vmul.f32 %v1452_v58, %v1446_v60 }
 0x54f   : > { %2050 = vmatmul.mubr.msk.f32.vlgmr.msra.gmra.mrb[4].mxu1 %vm854_vm0, %v1454_v62  ;;  %2061 = vmatmul.mubr.msk.f32.vlgmr.msra.gmra.mrb[6].mxu0 %vm854_vm0, %v1454_v62 }
 0x550   : > { %2079 = vmatprep.mubr.msk.f32.mxu1 %vm2641_vm1, %v2642_v14  ;;  %2126 = vmatpush3.bf16.msra.mxu1 %v2125_v33  ;;  %v1468_v14 = vld [vmem:[%s3394_s18 + $0x18] sm:$0xff] }
 0x551   : > { %2127 = vmatprep.subr.bf16.mxu1 %v2640_v6  ;;  %v2128_v3 = vpack.c.bf16 %v1468_v14, %v1467_v2 }
 0x554   : > { %2129 = vmatpush3.bf16.msra.mxu1 %v2128_v3 }
 0x555   : > { %2130 = vmatprep.subr.bf16.mxu1 %v2640_v6 }
 0x558   : > { %2132 = vmatpush3.bf16.msra.mxu1 %v2131_v5 }
 0x559   : > { %2133 = vmatprep.subr.bf16.mxu1 %v2640_v6 }
 0x55c   : > { %2135 = vmatpush3.bf16.msra.mxu1 %v2134_v9 }
 0x622   : > { %v1549_v11 = vpop.f32.mrb[4].mxu1  ;;  %v1625_v12 = vpop.f32.mrb[6].mxu0 }
 0x623   : > { %v1550_v13 = vadd.f32 %v1932_v10, %v1549_v11  ;;  %v2051_v15 = vpop.f32.mrb[5].mxu1  ;;  %v2062_v16 = vpop.f32.mrb[7].mxu0  ;;  %v1626_v24 = vadd.f32 %v1934_v21, %v1625_v12 }
 0x625   : > { %v1630_v6 = vmul.f32 0.044715, %v1550_v13  ;;  %v1629_v22 = vmul.f32 0.5, %v1550_v13 }
 0x627   : > { %v1631_v17 = vmul.f32 %v1630_v6, %v1550_v13 }
 0x629   : > { %v1632_v18 = vmul.f32 %v1631_v17, %v1550_v13 }
 0x62b   : > { %v1633_v19 = vadd.f32 %v1632_v18, %v1550_v13 }
 0x62d   : > { %v1634_v20 = vmul.f32 0.7978846, %v1633_v19 }
 0x62f   : > { %2289 = vtanh.f32 %v1634_v20 }
 0x639   : > { %v2290_v61 = vpop.eup %2289 }
 0x63a   : > { %v1636_v23 = vadd.f32 1.0, %v2290_v61 }
 0x63c   : > { %v1637_v25 = vmul.f32 %v1636_v23, %v1629_v22 }
 0x63e   : > { %v1638_v26 = vmul.f32 %v1637_v25, %v1626_v24 }
 0x640   : > { %2080 = vmatmul.mubr.msk.f32.vlgmr.msra.gmra.mrb[6].mxu1 %vm1645_vm7, %v1638_v26 }
 0x713   : > { %v1715_v28 = vpop.f32.mrb[6].mxu1 }
 0x714   : > { %v1716_v29 = vadd.f32 %v1936_v27, %v1715_v28  ;;  %v2081_v30 = vpop.f32.mrb[7].mxu1 }
 0x716   : > { %v1719_v31 = vadd.f32 %v1716_v29, %v3204_v38 }
 0x718   : > { %1720 = vst.msk [vmem:[%s844_s22] sm:$0xff] %vm854_vm0, %v1719_v31 }
 0x719   : > { %2558 = shalt.err (!%p2555_p2)
}
 0x71a   : > { %s2559_s27 = scalar_lea.hbm %s3264_s5, 128  ;;  %s2563_s3 = scalar_lea.hbm %s3399_s21, 256 }
 0x71b   : > { %p2560_p8 = scmp.ne.s32.totalorder %s3264_s5, %s2559_s27  ;;  %p2564_p6 = scmp.lt.u32.totalorder %s3264_s5, %s3399_s21 }
 0x71c   : > { %p2565_p12 = scmp.lt.u32.totalorder %s2563_s3, %s2559_s27  ;;  %p2567_p7 = scmp.lt.u32.totalorder %s2559_s27, %s3264_s5 }
 0x71d   : > { %p2561_p10 = pnand %p2560_p8, %p3400_p4 }
 0x71e   : > { %p2566_p5 = por %p2565_p12, %p2564_p6 }
 0x71f   : > { %p2562_p11 = pneg %p2561_p10 }
 0x720   : > { %p2568_p1 = por %p2567_p7, %p2566_p5 }
 0x722   : > { %p2569_p3 = pnand %p2568_p1, %p2562_p11 }
 0x724   : > { %2572 = shalt.err (!%p2569_p3)
}
 0x725   : > { %2170 = dma.vmem_to_hbm [thread:$0]  (%p3400_p4), %s3266_s1, 128, %s3264_s5, %s1722_s26  }
 0x726 PF: > { %s1747_s0 = sand.u32 1, %s2615_s4   ;;  %p3401_p9 = scmp.ne.s32.totalorder %s3373_s20, 0 }
 0x727   : > { %p3402_p13 = scmp.ge.s32.totalorder %s2627_s25, 2  ;;  %s1748_s29 = scalar_lea.sflag [#allocation4], %s1747_s0 }
 0x729   : > { %p2202_p0 = pnand %p3402_p13, %p3401_p9 }
 0x72b   : > { %2610 = dma.done.wait (!%p2202_p0), %s1748_s29, 128  }
 0x72c   : > { %2612 = vsyncadd (!%p2202_p0), %s1748_s29, 4294967168  ;;  %p40_p2 = scmp.ge.s32.totalorder %s2980_s6, 4   ;;  %s3403_s4 = smov %s2619_s30 }
 0x72d   : > { %s3404_s30 = smov %s2623_s24  ;;  %s3405_s24 = smov %s2991_s28 }
 0x72e   : > { %s3406_s25 = smov %s2980_s6  ;;  %42 = sbr.rel (!%p40_p2) target bundleno = 27 (0x1b), region = 192 }
 0x735   :  { %1753 = vsyncpa [#allocation3], 1 }
 0x736   :  { %1755 = vsyncpa [#allocation3 + $0x1], 1 }
 0x737   :  { %1756 = vsyncpa [#allocation6], 1 }
 0x738   :  { %1757 = vsyncpa [#allocation9], 1 }
 0x739   :  { %1758 = vsyncpa [#allocation12], 1 }
 0x73a   :  { %1759 = vsyncpa [#allocation15], 1 }
 0x73b   :  { %1760 = vsyncpa [#allocation4], 1 }
 0x73c   :  { %1762 = vsyncpa [#allocation4 + $0x1], 1 }

</bundles_post_ra>
